<compile_context>
chip_gen: v7x
topology: tpu7x:2x2x1
jax: 0.10.0
libtpu: 0.0.40
codegen_flags: <defaults>
</compile_context>

<pallas_src>
import functools

import jax
import jax.numpy as jnp
from jax import lax
from jax.experimental import pallas as pl
from jax.experimental.pallas import tpu as pltpu

HIDDEN_SIZE = 32
INPUT_SIZE = 8
NUM_LAYERS = 2
BATCH_PAD = 8  # one sublane tile

# Row offsets inside the packed (120, 128) parameter slab (all tile-aligned).
_ROW_WIH0 = 0                      # (INPUT_SIZE, 4H) -> rows 0:8
_ROW_WHH0 = 8                      # (H, 4H)          -> rows 8:40
_ROW_B0 = 40                       # (1, 4H)          -> rows 40:48 (padded)
_ROW_WIH1 = 48                     # (H, 4H)          -> rows 48:80
_ROW_WHH1 = 80                     # (H, 4H)          -> rows 80:112
_ROW_B1 = 112                      # (1, 4H)          -> rows 112:120 (padded)
_PARAM_ROWS = 120


def _cell(gates, c, H):
    """LSTM cell update from pre-activation gates in (i, f, o, g) column order.

    The i/f/o weight columns were pre-scaled by 0.5 in _prep_params, so a single
    tanh over the whole (8, 4H) vreg yields tanh(0.5*pre) for i/f/o (recovered
    as sigmoid via 0.5*t + 0.5, a free VPU affine) and tanh(pre) for g.
    One EUP push here + one for tanh(c_new) = 2 per cell (was 3).
    """
    t = jnp.tanh(gates)                       # single EUP push over (8, 4H)
    ifo = 0.5 * t[:, : 3 * H] + 0.5           # sigmoid of the unscaled pre-acts
    g = t[:, 3 * H:]
    i = ifo[:, 0 * H:1 * H]
    f = ifo[:, 1 * H:2 * H]
    o = ifo[:, 2 * H:3 * H]
    # TODO(synk): lane alignment of i/f/o/g vs c could save 1-2 XLU rotates per
    # cell; left as-is pending a bundle-level audit.
    c_new = f * c + i * g
    h_new = o * jnp.tanh(c_new)
    return h_new, c_new


def lstm_encoder_kernel(
    x_ref,      # (T*8, INPUT_SIZE)  VMEM, time-major rows padded to 8 per step
    p_ref,      # (120, 128)         VMEM, packed parameters (see row offsets)
    out_ref,    # (2, NUM_LAYERS, B, H) out: [hn; cn]
    *,
    T: int,
    B: int,
):
    H = HIDDEN_SIZE
    BP = BATCH_PAD
    H4 = 4 * H

    # Tile-aligned static slices of the packed parameter slab (zero-cost views,
    # loaded into vregs once, outside the recurrence).
    wih0 = p_ref[_ROW_WIH0:_ROW_WIH0 + INPUT_SIZE, :]
    whh0 = p_ref[_ROW_WHH0:_ROW_WHH0 + H, :]
    b0 = p_ref[_ROW_B0:_ROW_B0 + 1, :]
    wih1 = p_ref[_ROW_WIH1:_ROW_WIH1 + H, :]
    whh1 = p_ref[_ROW_WHH1:_ROW_WHH1 + H, :]
    b1 = p_ref[_ROW_B1:_ROW_B1 + 1, :]

    # Hoisted layer-0 input projection: one (T*8, I) x (I, 4H) MXU op + bias.
    gx0 = (
        jnp.dot(x_ref[...], wih0, preferred_element_type=jnp.float32) + b0
    )  # (T*8, 4H)

    zeros = jnp.zeros((BP, H), jnp.float32)
    h0, c0, h1, c1 = zeros, zeros, zeros, zeros
    # Recurrent half of the layer-1 gates for step 0: dot(h1=0, whh1) == 0.
    g1_rec = jnp.broadcast_to(b1, (BP, H4))

    # Static unroll over time (T is compile-time); h/c stay in vregs.
    # TODO(synk): training-mode dropout(0.25) between layers not implemented
    # (nn.LSTM dropout is identity in eval mode).
    for t in range(T):
        # ---- layer 0: recurrent matmul only (input part precomputed) ----
        g0 = gx0[t * BP:(t + 1) * BP, :] + jnp.dot(
            h0, whh0, preferred_element_type=jnp.float32)
        h0, c0 = _cell(g0, c0, H)

        # ---- layer 1: only the h0-dependent dot sits on the critical path ---
        g1 = jnp.dot(h0, wih1, preferred_element_type=jnp.float32) + g1_rec
        h1, c1 = _cell(g1, c1, H)

        # Recurrent half for the NEXT step: overlaps with layer-0 of step t+1.
        if t + 1 < T:
            g1_rec = jnp.dot(h1, whh1, preferred_element_type=jnp.float32) + b1

    # One-time (tiny) output stores; drop the batch padding rows here.
    out_ref[0, 0, :, :] = h0[:B, :]
    out_ref[0, 1, :, :] = h1[:B, :]
    out_ref[1, 0, :, :] = c0[:B, :]
    out_ref[1, 1, :, :] = c1[:B, :]


def _prep_params(wih0, whh0, b0, wih1, whh1, b1):
    """PyTorch-layout LSTM params -> one packed, tile-aligned (120, 128) slab.

    - transpose weights to (in, 4H)
    - permute gate columns from PyTorch (i,f,g,o) to (i,f,o,g) so the sigmoid
      gates are lane-contiguous
    - fold b_ih + b_hh into a single (1, 4H) bias per layer (done by caller
      passing b = b_ih + b_hh)
    - pre-scale i/f/o columns by 0.5 (sigmoid-via-tanh rewrite in the kernel)
    - stack everything at 8-row-aligned offsets into one (120, 128) array.
    """
    H = HIDDEN_SIZE
    perm = jnp.concatenate([
        jnp.arange(0 * H, 1 * H), jnp.arange(1 * H, 2 * H),
        jnp.arange(3 * H, 4 * H), jnp.arange(2 * H, 3 * H)])
    scale = jnp.concatenate(
        [jnp.full((3 * H,), 0.5, jnp.float32), jnp.ones((H,), jnp.float32)])

    def cols(w):  # w: PyTorch (4H, in) -> (in, 4H), permuted + i/f/o pre-scaled
        return w.T[:, perm] * scale

    def bias(b):
        return (b[perm] * scale).reshape(1, -1)

    def pad_rows(a, rows):
        return jnp.pad(a, ((0, rows - a.shape[0]), (0, 0)))

    packed = jnp.concatenate([
        pad_rows(cols(wih0), 8),     # rows 0:8
        cols(whh0),                  # rows 8:40
        pad_rows(bias(b0), 8),       # rows 40:48
        cols(wih1),                  # rows 48:80
        cols(whh1),                  # rows 80:112
        pad_rows(bias(b1), 8),       # rows 112:120
    ], axis=0).astype(jnp.float32)
    assert packed.shape == (_PARAM_ROWS, 4 * H)
    return packed


def encoder_forward(x, packed_params):
    """x: (B, T, INPUT_SIZE) float32. Returns (hn, cn), each (NUM_LAYERS, B, H)."""
    B, T, _ = x.shape
    assert B <= BATCH_PAD, "kernel assumes batch fits in one sublane tile"
    H = HIDDEN_SIZE

    # Time-major, batch padded to a full sublane tile (8 rows), then flattened:
    # row = t*8 + b. Padded rows evolve independently and are dropped on store.
    x_tm = jnp.transpose(x, (1, 0, 2)).astype(jnp.float32)          # (T, B, I)
    x_tm = jnp.pad(x_tm, ((0, 0), (0, BATCH_PAD - B), (0, 0)))      # (T, 8, I)
    x_tm = x_tm.reshape(T * BATCH_PAD, INPUT_SIZE)

    vmem = pl.BlockSpec(memory_space=pltpu.MemorySpace.VMEM)
    out = pl.pallas_call(
        functools.partial(lstm_encoder_kernel, T=T, B=B),
        out_shape=jax.ShapeDtypeStruct((2, NUM_LAYERS, B, H), jnp.float32),
        in_specs=[vmem, vmem],
        out_specs=vmem,
    )(x_tm, packed_params)
    return out[0], out[1]


# ----------------------------- pure-JAX reference -----------------------------
def _ref_layer(x_seq, wih, whh, b, H):
    """x_seq: (B, T, in). PyTorch weight layout: wih (4H, in), whh (4H, H)."""
    B = x_seq.shape[0]
    h = jnp.zeros((B, H), jnp.float32)
    c = jnp.zeros((B, H), jnp.float32)

    def step(carry, x_t):
        h, c = carry
        gates = x_t @ wih.T + h @ whh.T + b
        i = jax.nn.sigmoid(gates[:, 0 * H:1 * H])
        f = jax.nn.sigmoid(gates[:, 1 * H:2 * H])
        g = jnp.tanh(gates[:, 2 * H:3 * H])
        o = jax.nn.sigmoid(gates[:, 3 * H:4 * H])
        c = f * c + i * g
        h = o * jnp.tanh(c)
        return (h, c), h

    (h, c), hs = lax.scan(step, (h, c), jnp.transpose(x_seq, (1, 0, 2)))
    return jnp.transpose(hs, (1, 0, 2)), h, c


def encoder_reference(x, wih0, whh0, b0, wih1, whh1, b1):
    out0, h0, c0 = _ref_layer(x, wih0, whh0, b0, HIDDEN_SIZE)
    _, h1, c1 = _ref_layer(out0, wih1, whh1, b1, HIDDEN_SIZE)
    return jnp.stack([h0, h1]), jnp.stack([c0, c1])


# ------------------------------------ main ------------------------------------
if __name__ == "__main__":
    B, T = 2, 8  # batch=2, seq=8, input_size=8, hidden=32, num_layers=2

    key = jax.random.PRNGKey(0)
    kx, *wkeys = jax.random.split(key, 9)
    bound = 1.0 / (HIDDEN_SIZE ** 0.5)

    def u(k, shape):
        return jax.random.uniform(k, shape, jnp.float32, -bound, bound)

    # PyTorch-layout parameters (deterministic synthetic init).
    wih0 = u(wkeys[0], (4 * HIDDEN_SIZE, INPUT_SIZE))
    whh0 = u(wkeys[1], (4 * HIDDEN_SIZE, HIDDEN_SIZE))
    b0 = u(wkeys[2], (4 * HIDDEN_SIZE,)) + u(wkeys[3], (4 * HIDDEN_SIZE,))
    wih1 = u(wkeys[4], (4 * HIDDEN_SIZE, HIDDEN_SIZE))
    whh1 = u(wkeys[5], (4 * HIDDEN_SIZE, HIDDEN_SIZE))
    b1 = u(wkeys[6], (4 * HIDDEN_SIZE,)) + u(wkeys[7], (4 * HIDDEN_SIZE,))

    x = jax.random.normal(kx, (B, T, INPUT_SIZE), jnp.float32)

    # Kernel-layout params: packed/tile-aligned, gate-permuted, i/f/o pre-scaled.
    packed_params = _prep_params(wih0, whh0, b0, wih1, whh1, b1)

    hn, cn = encoder_forward(x, packed_params)
    jax.block_until_ready((hn, cn))

    hn_ref, cn_ref = encoder_reference(x, wih0, whh0, b0, wih1, whh1, b1)
    assert hn.shape == (NUM_LAYERS, B, HIDDEN_SIZE)
    assert cn.shape == (NUM_LAYERS, B, HIDDEN_SIZE)
    assert jnp.allclose(hn, hn_ref, atol=1e-5, rtol=1e-5), "hn mismatch"
    assert jnp.allclose(cn, cn_ref, atol=1e-5, rtol=1e-5), "cn mismatch"

    print("KERNEL_OK")
</pallas_src>

<mosaic_0001>
module attributes {stable_mosaic.version = 11 : i64} {
  func.func @lstm_encoder_kernel(%arg0: memref<64x8xf32, #tpu.memory_space<vmem>>, %arg1: memref<120x128xf32, #tpu.memory_space<vmem>>, %arg2: memref<2x2x2x32xf32, #tpu.memory_space<vmem>>) attributes {dimension_semantics = [], scalar_prefetch = 0 : i64, scratch_operands = 0 : i64, tpu.core_type = #tpu.core_type<tc>} {
    %c0 = arith.constant 0 : index
    %c0_0 = arith.constant 0 : index
    %0 = vector.load %arg1[%c0, %c0_0] : memref<120x128xf32, #tpu.memory_space<vmem>>, vector<8x128xf32>
    %c8 = arith.constant 8 : index
    %c0_1 = arith.constant 0 : index
    %1 = vector.load %arg1[%c8, %c0_1] : memref<120x128xf32, #tpu.memory_space<vmem>>, vector<32x128xf32>
    %c40 = arith.constant 40 : index
    %c0_2 = arith.constant 0 : index
    %2 = vector.load %arg1[%c40, %c0_2] : memref<120x128xf32, #tpu.memory_space<vmem>>, vector<1x128xf32>
    %c48 = arith.constant 48 : index
    %c0_3 = arith.constant 0 : index
    %3 = vector.load %arg1[%c48, %c0_3] : memref<120x128xf32, #tpu.memory_space<vmem>>, vector<32x128xf32>
    %c80 = arith.constant 80 : index
    %c0_4 = arith.constant 0 : index
    %4 = vector.load %arg1[%c80, %c0_4] : memref<120x128xf32, #tpu.memory_space<vmem>>, vector<32x128xf32>
    %c112 = arith.constant 112 : index
    %c0_5 = arith.constant 0 : index
    %5 = vector.load %arg1[%c112, %c0_5] : memref<120x128xf32, #tpu.memory_space<vmem>>, vector<1x128xf32>
    %c0_6 = arith.constant 0 : index
    %c0_7 = arith.constant 0 : index
    %6 = vector.load %arg0[%c0_6, %c0_7] : memref<64x8xf32, #tpu.memory_space<vmem>>, vector<64x8xf32>
    %cst = arith.constant dense<0.000000e+00> : vector<64x128xf32>
    %7 = tpu.matmul %6, %0, %cst {dimension_numbers = #tpu.dot_dimension_numbers<[1], [0], [0], [1], [0, 0, 1, 1], [], []>} : vector<64x8xf32>, vector<8x128xf32>, vector<64x128xf32> -> vector<64x128xf32>
    %8 = vector.broadcast %2 : vector<1x128xf32> to vector<64x128xf32>
    %9 = arith.addf %7, %8 : vector<64x128xf32>
    %cst_8 = arith.constant 0.000000e+00 : f32
    %10 = vector.broadcast %cst_8 : f32 to vector<8x32xf32>
    %11 = vector.shape_cast %5 : vector<1x128xf32> to vector<1x128xf32>
    %12 = vector.broadcast %11 : vector<1x128xf32> to vector<8x128xf32>
    %13 = vector.extract_strided_slice %9 {offsets = [0, 0], sizes = [8, 128], strides = [1, 1]} : vector<64x128xf32> to vector<8x128xf32>
    %cst_9 = arith.constant dense<0.000000e+00> : vector<8x128xf32>
    %14 = tpu.matmul %10, %1, %cst_9 {dimension_numbers = #tpu.dot_dimension_numbers<[1], [0], [0], [1], [0, 0, 1, 1], [], []>} : vector<8x32xf32>, vector<32x128xf32>, vector<8x128xf32> -> vector<8x128xf32>
    %15 = arith.addf %13, %14 : vector<8x128xf32>
    %16 = math.tanh %15 : vector<8x128xf32>
    %17 = vector.extract_strided_slice %16 {offsets = [0, 0], sizes = [8, 96], strides = [1, 1]} : vector<8x128xf32> to vector<8x96xf32>
    %cst_10 = arith.constant 5.000000e-01 : f32
    %18 = vector.broadcast %cst_10 : f32 to vector<8x96xf32>
    %19 = arith.mulf %18, %17 : vector<8x96xf32>
    %cst_11 = arith.constant 5.000000e-01 : f32
    %20 = vector.broadcast %cst_11 : f32 to vector<8x96xf32>
    %21 = arith.addf %19, %20 : vector<8x96xf32>
    %22 = vector.extract_strided_slice %16 {offsets = [0, 96], sizes = [8, 32], strides = [1, 1]} : vector<8x128xf32> to vector<8x32xf32>
    %23 = vector.extract_strided_slice %21 {offsets = [0, 0], sizes = [8, 32], strides = [1, 1]} : vector<8x96xf32> to vector<8x32xf32>
    %24 = vector.extract_strided_slice %21 {offsets = [0, 32], sizes = [8, 32], strides = [1, 1]} : vector<8x96xf32> to vector<8x32xf32>
    %25 = vector.extract_strided_slice %21 {offsets = [0, 64], sizes = [8, 32], strides = [1, 1]} : vector<8x96xf32> to vector<8x32xf32>
    %26 = arith.mulf %24, %10 : vector<8x32xf32>
    %27 = arith.mulf %23, %22 : vector<8x32xf32>
    %28 = arith.addf %26, %27 : vector<8x32xf32>
    %29 = math.tanh %28 : vector<8x32xf32>
    %30 = arith.mulf %25, %29 : vector<8x32xf32>
    %cst_12 = arith.constant dense<0.000000e+00> : vector<8x128xf32>
    %31 = tpu.matmul %30, %3, %cst_12 {dimension_numbers = #tpu.dot_dimension_numbers<[1], [0], [0], [1], [0, 0, 1, 1], [], []>} : vector<8x32xf32>, vector<32x128xf32>, vector<8x128xf32> -> vector<8x128xf32>
    %32 = arith.addf %31, %12 : vector<8x128xf32>
    %33 = math.tanh %32 : vector<8x128xf32>
    %34 = vector.extract_strided_slice %33 {offsets = [0, 0], sizes = [8, 96], strides = [1, 1]} : vector<8x128xf32> to vector<8x96xf32>
    %cst_13 = arith.constant 5.000000e-01 : f32
    %35 = vector.broadcast %cst_13 : f32 to vector<8x96xf32>
    %36 = arith.mulf %35, %34 : vector<8x96xf32>
    %cst_14 = arith.constant 5.000000e-01 : f32
    %37 = vector.broadcast %cst_14 : f32 to vector<8x96xf32>
    %38 = arith.addf %36, %37 : vector<8x96xf32>
    %39 = vector.extract_strided_slice %33 {offsets = [0, 96], sizes = [8, 32], strides = [1, 1]} : vector<8x128xf32> to vector<8x32xf32>
    %40 = vector.extract_strided_slice %38 {offsets = [0, 0], sizes = [8, 32], strides = [1, 1]} : vector<8x96xf32> to vector<8x32xf32>
    %41 = vector.extract_strided_slice %38 {offsets = [0, 32], sizes = [8, 32], strides = [1, 1]} : vector<8x96xf32> to vector<8x32xf32>
    %42 = vector.extract_strided_slice %38 {offsets = [0, 64], sizes = [8, 32], strides = [1, 1]} : vector<8x96xf32> to vector<8x32xf32>
    %43 = arith.mulf %41, %10 : vector<8x32xf32>
    %44 = arith.mulf %40, %39 : vector<8x32xf32>
    %45 = arith.addf %43, %44 : vector<8x32xf32>
    %46 = math.tanh %45 : vector<8x32xf32>
    %47 = arith.mulf %42, %46 : vector<8x32xf32>
    %cst_15 = arith.constant dense<0.000000e+00> : vector<8x128xf32>
    %48 = tpu.matmul %47, %4, %cst_15 {dimension_numbers = #tpu.dot_dimension_numbers<[1], [0], [0], [1], [0, 0, 1, 1], [], []>} : vector<8x32xf32>, vector<32x128xf32>, vector<8x128xf32> -> vector<8x128xf32>
    %49 = vector.broadcast %5 : vector<1x128xf32> to vector<8x128xf32>
    %50 = arith.addf %48, %49 : vector<8x128xf32>
    %51 = vector.extract_strided_slice %9 {offsets = [8, 0], sizes = [8, 128], strides = [1, 1]} : vector<64x128xf32> to vector<8x128xf32>
    %cst_16 = arith.constant dense<0.000000e+00> : vector<8x128xf32>
    %52 = tpu.matmul %30, %1, %cst_16 {dimension_numbers = #tpu.dot_dimension_numbers<[1], [0], [0], [1], [0, 0, 1, 1], [], []>} : vector<8x32xf32>, vector<32x128xf32>, vector<8x128xf32> -> vector<8x128xf32>
    %53 = arith.addf %51, %52 : vector<8x128xf32>
    %54 = math.tanh %53 : vector<8x128xf32>
    %55 = vector.extract_strided_slice %54 {offsets = [0, 0], sizes = [8, 96], strides = [1, 1]} : vector<8x128xf32> to vector<8x96xf32>
    %cst_17 = arith.constant 5.000000e-01 : f32
    %56 = vector.broadcast %cst_17 : f32 to vector<8x96xf32>
    %57 = arith.mulf %56, %55 : vector<8x96xf32>
    %cst_18 = arith.constant 5.000000e-01 : f32
    %58 = vector.broadcast %cst_18 : f32 to vector<8x96xf32>
    %59 = arith.addf %57, %58 : vector<8x96xf32>
    %60 = vector.extract_strided_slice %54 {offsets = [0, 96], sizes = [8, 32], strides = [1, 1]} : vector<8x128xf32> to vector<8x32xf32>
    %61 = vector.extract_strided_slice %59 {offsets = [0, 0], sizes = [8, 32], strides = [1, 1]} : vector<8x96xf32> to vector<8x32xf32>
    %62 = vector.extract_strided_slice %59 {offsets = [0, 32], sizes = [8, 32], strides = [1, 1]} : vector<8x96xf32> to vector<8x32xf32>
    %63 = vector.extract_strided_slice %59 {offsets = [0, 64], sizes = [8, 32], strides = [1, 1]} : vector<8x96xf32> to vector<8x32xf32>
    %64 = arith.mulf %62, %28 : vector<8x32xf32>
    %65 = arith.mulf %61, %60 : vector<8x32xf32>
    %66 = arith.addf %64, %65 : vector<8x32xf32>
    %67 = math.tanh %66 : vector<8x32xf32>
    %68 = arith.mulf %63, %67 : vector<8x32xf32>
    %cst_19 = arith.constant dense<0.000000e+00> : vector<8x128xf32>
    %69 = tpu.matmul %68, %3, %cst_19 {dimension_numbers = #tpu.dot_dimension_numbers<[1], [0], [0], [1], [0, 0, 1, 1], [], []>} : vector<8x32xf32>, vector<32x128xf32>, vector<8x128xf32> -> vector<8x128xf32>
    %70 = arith.addf %69, %50 : vector<8x128xf32>
    %71 = math.tanh %70 : vector<8x128xf32>
    %72 = vector.extract_strided_slice %71 {offsets = [0, 0], sizes = [8, 96], strides = [1, 1]} : vector<8x128xf32> to vector<8x96xf32>
    %cst_20 = arith.constant 5.000000e-01 : f32
    %73 = vector.broadcast %cst_20 : f32 to vector<8x96xf32>
    %74 = arith.mulf %73, %72 : vector<8x96xf32>
    %cst_21 = arith.constant 5.000000e-01 : f32
    %75 = vector.broadcast %cst_21 : f32 to vector<8x96xf32>
    %76 = arith.addf %74, %75 : vector<8x96xf32>
    %77 = vector.extract_strided_slice %71 {offsets = [0, 96], sizes = [8, 32], strides = [1, 1]} : vector<8x128xf32> to vector<8x32xf32>
    %78 = vector.extract_strided_slice %76 {offsets = [0, 0], sizes = [8, 32], strides = [1, 1]} : vector<8x96xf32> to vector<8x32xf32>
    %79 = vector.extract_strided_slice %76 {offsets = [0, 32], sizes = [8, 32], strides = [1, 1]} : vector<8x96xf32> to vector<8x32xf32>
    %80 = vector.extract_strided_slice %76 {offsets = [0, 64], sizes = [8, 32], strides = [1, 1]} : vector<8x96xf32> to vector<8x32xf32>
    %81 = arith.mulf %79, %45 : vector<8x32xf32>
    %82 = arith.mulf %78, %77 : vector<8x32xf32>
    %83 = arith.addf %81, %82 : vector<8x32xf32>
    %84 = math.tanh %83 : vector<8x32xf32>
    %85 = arith.mulf %80, %84 : vector<8x32xf32>
    %cst_22 = arith.constant dense<0.000000e+00> : vector<8x128xf32>
    %86 = tpu.matmul %85, %4, %cst_22 {dimension_numbers = #tpu.dot_dimension_numbers<[1], [0], [0], [1], [0, 0, 1, 1], [], []>} : vector<8x32xf32>, vector<32x128xf32>, vector<8x128xf32> -> vector<8x128xf32>
    %87 = vector.broadcast %5 : vector<1x128xf32> to vector<8x128xf32>
    %88 = arith.addf %86, %87 : vector<8x128xf32>
    %89 = vector.extract_strided_slice %9 {offsets = [16, 0], sizes = [8, 128], strides = [1, 1]} : vector<64x128xf32> to vector<8x128xf32>
    %cst_23 = arith.constant dense<0.000000e+00> : vector<8x128xf32>
    %90 = tpu.matmul %68, %1, %cst_23 {dimension_numbers = #tpu.dot_dimension_numbers<[1], [0], [0], [1], [0, 0, 1, 1], [], []>} : vector<8x32xf32>, vector<32x128xf32>, vector<8x128xf32> -> vector<8x128xf32>
    %91 = arith.addf %89, %90 : vector<8x128xf32>
    %92 = math.tanh %91 : vector<8x128xf32>
    %93 = vector.extract_strided_slice %92 {offsets = [0, 0], sizes = [8, 96], strides = [1, 1]} : vector<8x128xf32> to vector<8x96xf32>
    %cst_24 = arith.constant 5.000000e-01 : f32
    %94 = vector.broadcast %cst_24 : f32 to vector<8x96xf32>
    %95 = arith.mulf %94, %93 : vector<8x96xf32>
    %cst_25 = arith.constant 5.000000e-01 : f32
    %96 = vector.broadcast %cst_25 : f32 to vector<8x96xf32>
    %97 = arith.addf %95, %96 : vector<8x96xf32>
    %98 = vector.extract_strided_slice %92 {offsets = [0, 96], sizes = [8, 32], strides = [1, 1]} : vector<8x128xf32> to vector<8x32xf32>
    %99 = vector.extract_strided_slice %97 {offsets = [0, 0], sizes = [8, 32], strides = [1, 1]} : vector<8x96xf32> to vector<8x32xf32>
    %100 = vector.extract_strided_slice %97 {offsets = [0, 32], sizes = [8, 32], strides = [1, 1]} : vector<8x96xf32> to vector<8x32xf32>
    %101 = vector.extract_strided_slice %97 {offsets = [0, 64], sizes = [8, 32], strides = [1, 1]} : vector<8x96xf32> to vector<8x32xf32>
    %102 = arith.mulf %100, %66 : vector<8x32xf32>
    %103 = arith.mulf %99, %98 : vector<8x32xf32>
    %104 = arith.addf %102, %103 : vector<8x32xf32>
    %105 = math.tanh %104 : vector<8x32xf32>
    %106 = arith.mulf %101, %105 : vector<8x32xf32>
    %cst_26 = arith.constant dense<0.000000e+00> : vector<8x128xf32>
    %107 = tpu.matmul %106, %3, %cst_26 {dimension_numbers = #tpu.dot_dimension_numbers<[1], [0], [0], [1], [0, 0, 1, 1], [], []>} : vector<8x32xf32>, vector<32x128xf32>, vector<8x128xf32> -> vector<8x128xf32>
    %108 = arith.addf %107, %88 : vector<8x128xf32>
    %109 = math.tanh %108 : vector<8x128xf32>
    %110 = vector.extract_strided_slice %109 {offsets = [0, 0], sizes = [8, 96], strides = [1, 1]} : vector<8x128xf32> to vector<8x96xf32>
    %cst_27 = arith.constant 5.000000e-01 : f32
    %111 = vector.broadcast %cst_27 : f32 to vector<8x96xf32>
    %112 = arith.mulf %111, %110 : vector<8x96xf32>
    %cst_28 = arith.constant 5.000000e-01 : f32
    %113 = vector.broadcast %cst_28 : f32 to vector<8x96xf32>
    %114 = arith.addf %112, %113 : vector<8x96xf32>
    %115 = vector.extract_strided_slice %109 {offsets = [0, 96], sizes = [8, 32], strides = [1, 1]} : vector<8x128xf32> to vector<8x32xf32>
    %116 = vector.extract_strided_slice %114 {offsets = [0, 0], sizes = [8, 32], strides = [1, 1]} : vector<8x96xf32> to vector<8x32xf32>
    %117 = vector.extract_strided_slice %114 {offsets = [0, 32], sizes = [8, 32], strides = [1, 1]} : vector<8x96xf32> to vector<8x32xf32>
    %118 = vector.extract_strided_slice %114 {offsets = [0, 64], sizes = [8, 32], strides = [1, 1]} : vector<8x96xf32> to vector<8x32xf32>
    %119 = arith.mulf %117, %83 : vector<8x32xf32>
    %120 = arith.mulf %116, %115 : vector<8x32xf32>
    %121 = arith.addf %119, %120 : vector<8x32xf32>
    %122 = math.tanh %121 : vector<8x32xf32>
    %123 = arith.mulf %118, %122 : vector<8x32xf32>
    %cst_29 = arith.constant dense<0.000000e+00> : vector<8x128xf32>
    %124 = tpu.matmul %123, %4, %cst_29 {dimension_numbers = #tpu.dot_dimension_numbers<[1], [0], [0], [1], [0, 0, 1, 1], [], []>} : vector<8x32xf32>, vector<32x128xf32>, vector<8x128xf32> -> vector<8x128xf32>
    %125 = vector.broadcast %5 : vector<1x128xf32> to vector<8x128xf32>
    %126 = arith.addf %124, %125 : vector<8x128xf32>
    %127 = vector.extract_strided_slice %9 {offsets = [24, 0], sizes = [8, 128], strides = [1, 1]} : vector<64x128xf32> to vector<8x128xf32>
    %cst_30 = arith.constant dense<0.000000e+00> : vector<8x128xf32>
    %128 = tpu.matmul %106, %1, %cst_30 {dimension_numbers = #tpu.dot_dimension_numbers<[1], [0], [0], [1], [0, 0, 1, 1], [], []>} : vector<8x32xf32>, vector<32x128xf32>, vector<8x128xf32> -> vector<8x128xf32>
    %129 = arith.addf %127, %128 : vector<8x128xf32>
    %130 = math.tanh %129 : vector<8x128xf32>
    %131 = vector.extract_strided_slice %130 {offsets = [0, 0], sizes = [8, 96], strides = [1, 1]} : vector<8x128xf32> to vector<8x96xf32>
    %cst_31 = arith.constant 5.000000e-01 : f32
    %132 = vector.broadcast %cst_31 : f32 to vector<8x96xf32>
    %133 = arith.mulf %132, %131 : vector<8x96xf32>
    %cst_32 = arith.constant 5.000000e-01 : f32
    %134 = vector.broadcast %cst_32 : f32 to vector<8x96xf32>
    %135 = arith.addf %133, %134 : vector<8x96xf32>
    %136 = vector.extract_strided_slice %130 {offsets = [0, 96], sizes = [8, 32], strides = [1, 1]} : vector<8x128xf32> to vector<8x32xf32>
    %137 = vector.extract_strided_slice %135 {offsets = [0, 0], sizes = [8, 32], strides = [1, 1]} : vector<8x96xf32> to vector<8x32xf32>
    %138 = vector.extract_strided_slice %135 {offsets = [0, 32], sizes = [8, 32], strides = [1, 1]} : vector<8x96xf32> to vector<8x32xf32>
    %139 = vector.extract_strided_slice %135 {offsets = [0, 64], sizes = [8, 32], strides = [1, 1]} : vector<8x96xf32> to vector<8x32xf32>
    %140 = arith.mulf %138, %104 : vector<8x32xf32>
    %141 = arith.mulf %137, %136 : vector<8x32xf32>
    %142 = arith.addf %140, %141 : vector<8x32xf32>
    %143 = math.tanh %142 : vector<8x32xf32>
    %144 = arith.mulf %139, %143 : vector<8x32xf32>
    %cst_33 = arith.constant dense<0.000000e+00> : vector<8x128xf32>
    %145 = tpu.matmul %144, %3, %cst_33 {dimension_numbers = #tpu.dot_dimension_numbers<[1], [0], [0], [1], [0, 0, 1, 1], [], []>} : vector<8x32xf32>, vector<32x128xf32>, vector<8x128xf32> -> vector<8x128xf32>
    %146 = arith.addf %145, %126 : vector<8x128xf32>
    %147 = math.tanh %146 : vector<8x128xf32>
    %148 = vector.extract_strided_slice %147 {offsets = [0, 0], sizes = [8, 96], strides = [1, 1]} : vector<8x128xf32> to vector<8x96xf32>
    %cst_34 = arith.constant 5.000000e-01 : f32
    %149 = vector.broadcast %cst_34 : f32 to vector<8x96xf32>
    %150 = arith.mulf %149, %148 : vector<8x96xf32>
    %cst_35 = arith.constant 5.000000e-01 : f32
    %151 = vector.broadcast %cst_35 : f32 to vector<8x96xf32>
    %152 = arith.addf %150, %151 : vector<8x96xf32>
    %153 = vector.extract_strided_slice %147 {offsets = [0, 96], sizes = [8, 32], strides = [1, 1]} : vector<8x128xf32> to vector<8x32xf32>
    %154 = vector.extract_strided_slice %152 {offsets = [0, 0], sizes = [8, 32], strides = [1, 1]} : vector<8x96xf32> to vector<8x32xf32>
    %155 = vector.extract_strided_slice %152 {offsets = [0, 32], sizes = [8, 32], strides = [1, 1]} : vector<8x96xf32> to vector<8x32xf32>
    %156 = vector.extract_strided_slice %152 {offsets = [0, 64], sizes = [8, 32], strides = [1, 1]} : vector<8x96xf32> to vector<8x32xf32>
    %157 = arith.mulf %155, %121 : vector<8x32xf32>
    %158 = arith.mulf %154, %153 : vector<8x32xf32>
    %159 = arith.addf %157, %158 : vector<8x32xf32>
    %160 = math.tanh %159 : vector<8x32xf32>
    %161 = arith.mulf %156, %160 : vector<8x32xf32>
    %cst_36 = arith.constant dense<0.000000e+00> : vector<8x128xf32>
    %162 = tpu.matmul %161, %4, %cst_36 {dimension_numbers = #tpu.dot_dimension_numbers<[1], [0], [0], [1], [0, 0, 1, 1], [], []>} : vector<8x32xf32>, vector<32x128xf32>, vector<8x128xf32> -> vector<8x128xf32>
    %163 = vector.broadcast %5 : vector<1x128xf32> to vector<8x128xf32>
    %164 = arith.addf %162, %163 : vector<8x128xf32>
    %165 = vector.extract_strided_slice %9 {offsets = [32, 0], sizes = [8, 128], strides = [1, 1]} : vector<64x128xf32> to vector<8x128xf32>
    %cst_37 = arith.constant dense<0.000000e+00> : vector<8x128xf32>
    %166 = tpu.matmul %144, %1, %cst_37 {dimension_numbers = #tpu.dot_dimension_numbers<[1], [0], [0], [1], [0, 0, 1, 1], [], []>} : vector<8x32xf32>, vector<32x128xf32>, vector<8x128xf32> -> vector<8x128xf32>
    %167 = arith.addf %165, %166 : vector<8x128xf32>
    %168 = math.tanh %167 : vector<8x128xf32>
    %169 = vector.extract_strided_slice %168 {offsets = [0, 0], sizes = [8, 96], strides = [1, 1]} : vector<8x128xf32> to vector<8x96xf32>
    %cst_38 = arith.constant 5.000000e-01 : f32
    %170 = vector.broadcast %cst_38 : f32 to vector<8x96xf32>
    %171 = arith.mulf %170, %169 : vector<8x96xf32>
    %cst_39 = arith.constant 5.000000e-01 : f32
    %172 = vector.broadcast %cst_39 : f32 to vector<8x96xf32>
    %173 = arith.addf %171, %172 : vector<8x96xf32>
    %174 = vector.extract_strided_slice %168 {offsets = [0, 96], sizes = [8, 32], strides = [1, 1]} : vector<8x128xf32> to vector<8x32xf32>
    %175 = vector.extract_strided_slice %173 {offsets = [0, 0], sizes = [8, 32], strides = [1, 1]} : vector<8x96xf32> to vector<8x32xf32>
    %176 = vector.extract_strided_slice %173 {offsets = [0, 32], sizes = [8, 32], strides = [1, 1]} : vector<8x96xf32> to vector<8x32xf32>
    %177 = vector.extract_strided_slice %173 {offsets = [0, 64], sizes = [8, 32], strides = [1, 1]} : vector<8x96xf32> to vector<8x32xf32>
    %178 = arith.mulf %176, %142 : vector<8x32xf32>
    %179 = arith.mulf %175, %174 : vector<8x32xf32>
    %180 = arith.addf %178, %179 : vector<8x32xf32>
    %181 = math.tanh %180 : vector<8x32xf32>
    %182 = arith.mulf %177, %181 : vector<8x32xf32>
    %cst_40 = arith.constant dense<0.000000e+00> : vector<8x128xf32>
    %183 = tpu.matmul %182, %3, %cst_40 {dimension_numbers = #tpu.dot_dimension_numbers<[1], [0], [0], [1], [0, 0, 1, 1], [], []>} : vector<8x32xf32>, vector<32x128xf32>, vector<8x128xf32> -> vector<8x128xf32>
    %184 = arith.addf %183, %164 : vector<8x128xf32>
    %185 = math.tanh %184 : vector<8x128xf32>
    %186 = vector.extract_strided_slice %185 {offsets = [0, 0], sizes = [8, 96], strides = [1, 1]} : vector<8x128xf32> to vector<8x96xf32>
    %cst_41 = arith.constant 5.000000e-01 : f32
    %187 = vector.broadcast %cst_41 : f32 to vector<8x96xf32>
    %188 = arith.mulf %187, %186 : vector<8x96xf32>
    %cst_42 = arith.constant 5.000000e-01 : f32
    %189 = vector.broadcast %cst_42 : f32 to vector<8x96xf32>
    %190 = arith.addf %188, %189 : vector<8x96xf32>
    %191 = vector.extract_strided_slice %185 {offsets = [0, 96], sizes = [8, 32], strides = [1, 1]} : vector<8x128xf32> to vector<8x32xf32>
    %192 = vector.extract_strided_slice %190 {offsets = [0, 0], sizes = [8, 32], strides = [1, 1]} : vector<8x96xf32> to vector<8x32xf32>
    %193 = vector.extract_strided_slice %190 {offsets = [0, 32], sizes = [8, 32], strides = [1, 1]} : vector<8x96xf32> to vector<8x32xf32>
    %194 = vector.extract_strided_slice %190 {offsets = [0, 64], sizes = [8, 32], strides = [1, 1]} : vector<8x96xf32> to vector<8x32xf32>
    %195 = arith.mulf %193, %159 : vector<8x32xf32>
    %196 = arith.mulf %192, %191 : vector<8x32xf32>
    %197 = arith.addf %195, %196 : vector<8x32xf32>
    %198 = math.tanh %197 : vector<8x32xf32>
    %199 = arith.mulf %194, %198 : vector<8x32xf32>
    %cst_43 = arith.constant dense<0.000000e+00> : vector<8x128xf32>
    %200 = tpu.matmul %199, %4, %cst_43 {dimension_numbers = #tpu.dot_dimension_numbers<[1], [0], [0], [1], [0, 0, 1, 1], [], []>} : vector<8x32xf32>, vector<32x128xf32>, vector<8x128xf32> -> vector<8x128xf32>
    %201 = vector.broadcast %5 : vector<1x128xf32> to vector<8x128xf32>
    %202 = arith.addf %200, %201 : vector<8x128xf32>
    %203 = vector.extract_strided_slice %9 {offsets = [40, 0], sizes = [8, 128], strides = [1, 1]} : vector<64x128xf32> to vector<8x128xf32>
    %cst_44 = arith.constant dense<0.000000e+00> : vector<8x128xf32>
    %204 = tpu.matmul %182, %1, %cst_44 {dimension_numbers = #tpu.dot_dimension_numbers<[1], [0], [0], [1], [0, 0, 1, 1], [], []>} : vector<8x32xf32>, vector<32x128xf32>, vector<8x128xf32> -> vector<8x128xf32>
    %205 = arith.addf %203, %204 : vector<8x128xf32>
    %206 = math.tanh %205 : vector<8x128xf32>
    %207 = vector.extract_strided_slice %206 {offsets = [0, 0], sizes = [8, 96], strides = [1, 1]} : vector<8x128xf32> to vector<8x96xf32>
    %cst_45 = arith.constant 5.000000e-01 : f32
    %208 = vector.broadcast %cst_45 : f32 to vector<8x96xf32>
    %209 = arith.mulf %208, %207 : vector<8x96xf32>
    %cst_46 = arith.constant 5.000000e-01 : f32
    %210 = vector.broadcast %cst_46 : f32 to vector<8x96xf32>
    %211 = arith.addf %209, %210 : vector<8x96xf32>
    %212 = vector.extract_strided_slice %206 {offsets = [0, 96], sizes = [8, 32], strides = [1, 1]} : vector<8x128xf32> to vector<8x32xf32>
    %213 = vector.extract_strided_slice %211 {offsets = [0, 0], sizes = [8, 32], strides = [1, 1]} : vector<8x96xf32> to vector<8x32xf32>
    %214 = vector.extract_strided_slice %211 {offsets = [0, 32], sizes = [8, 32], strides = [1, 1]} : vector<8x96xf32> to vector<8x32xf32>
    %215 = vector.extract_strided_slice %211 {offsets = [0, 64], sizes = [8, 32], strides = [1, 1]} : vector<8x96xf32> to vector<8x32xf32>
    %216 = arith.mulf %214, %180 : vector<8x32xf32>
    %217 = arith.mulf %213, %212 : vector<8x32xf32>
    %218 = arith.addf %216, %217 : vector<8x32xf32>
    %219 = math.tanh %218 : vector<8x32xf32>
    %220 = arith.mulf %215, %219 : vector<8x32xf32>
    %cst_47 = arith.constant dense<0.000000e+00> : vector<8x128xf32>
    %221 = tpu.matmul %220, %3, %cst_47 {dimension_numbers = #tpu.dot_dimension_numbers<[1], [0], [0], [1], [0, 0, 1, 1], [], []>} : vector<8x32xf32>, vector<32x128xf32>, vector<8x128xf32> -> vector<8x128xf32>
    %222 = arith.addf %221, %202 : vector<8x128xf32>
    %223 = math.tanh %222 : vector<8x128xf32>
    %224 = vector.extract_strided_slice %223 {offsets = [0, 0], sizes = [8, 96], strides = [1, 1]} : vector<8x128xf32> to vector<8x96xf32>
    %cst_48 = arith.constant 5.000000e-01 : f32
    %225 = vector.broadcast %cst_48 : f32 to vector<8x96xf32>
    %226 = arith.mulf %225, %224 : vector<8x96xf32>
    %cst_49 = arith.constant 5.000000e-01 : f32
    %227 = vector.broadcast %cst_49 : f32 to vector<8x96xf32>
    %228 = arith.addf %226, %227 : vector<8x96xf32>
    %229 = vector.extract_strided_slice %223 {offsets = [0, 96], sizes = [8, 32], strides = [1, 1]} : vector<8x128xf32> to vector<8x32xf32>
    %230 = vector.extract_strided_slice %228 {offsets = [0, 0], sizes = [8, 32], strides = [1, 1]} : vector<8x96xf32> to vector<8x32xf32>
    %231 = vector.extract_strided_slice %228 {offsets = [0, 32], sizes = [8, 32], strides = [1, 1]} : vector<8x96xf32> to vector<8x32xf32>
    %232 = vector.extract_strided_slice %228 {offsets = [0, 64], sizes = [8, 32], strides = [1, 1]} : vector<8x96xf32> to vector<8x32xf32>
    %233 = arith.mulf %231, %197 : vector<8x32xf32>
    %234 = arith.mulf %230, %229 : vector<8x32xf32>
    %235 = arith.addf %233, %234 : vector<8x32xf32>
    %236 = math.tanh %235 : vector<8x32xf32>
    %237 = arith.mulf %232, %236 : vector<8x32xf32>
    %cst_50 = arith.constant dense<0.000000e+00> : vector<8x128xf32>
    %238 = tpu.matmul %237, %4, %cst_50 {dimension_numbers = #tpu.dot_dimension_numbers<[1], [0], [0], [1], [0, 0, 1, 1], [], []>} : vector<8x32xf32>, vector<32x128xf32>, vector<8x128xf32> -> vector<8x128xf32>
    %239 = vector.broadcast %5 : vector<1x128xf32> to vector<8x128xf32>
    %240 = arith.addf %238, %239 : vector<8x128xf32>
    %241 = vector.extract_strided_slice %9 {offsets = [48, 0], sizes = [8, 128], strides = [1, 1]} : vector<64x128xf32> to vector<8x128xf32>
    %cst_51 = arith.constant dense<0.000000e+00> : vector<8x128xf32>
    %242 = tpu.matmul %220, %1, %cst_51 {dimension_numbers = #tpu.dot_dimension_numbers<[1], [0], [0], [1], [0, 0, 1, 1], [], []>} : vector<8x32xf32>, vector<32x128xf32>, vector<8x128xf32> -> vector<8x128xf32>
    %243 = arith.addf %241, %242 : vector<8x128xf32>
    %244 = math.tanh %243 : vector<8x128xf32>
    %245 = vector.extract_strided_slice %244 {offsets = [0, 0], sizes = [8, 96], strides = [1, 1]} : vector<8x128xf32> to vector<8x96xf32>
    %cst_52 = arith.constant 5.000000e-01 : f32
    %246 = vector.broadcast %cst_52 : f32 to vector<8x96xf32>
    %247 = arith.mulf %246, %245 : vector<8x96xf32>
    %cst_53 = arith.constant 5.000000e-01 : f32
    %248 = vector.broadcast %cst_53 : f32 to vector<8x96xf32>
    %249 = arith.addf %247, %248 : vector<8x96xf32>
    %250 = vector.extract_strided_slice %244 {offsets = [0, 96], sizes = [8, 32], strides = [1, 1]} : vector<8x128xf32> to vector<8x32xf32>
    %251 = vector.extract_strided_slice %249 {offsets = [0, 0], sizes = [8, 32], strides = [1, 1]} : vector<8x96xf32> to vector<8x32xf32>
    %252 = vector.extract_strided_slice %249 {offsets = [0, 32], sizes = [8, 32], strides = [1, 1]} : vector<8x96xf32> to vector<8x32xf32>
    %253 = vector.extract_strided_slice %249 {offsets = [0, 64], sizes = [8, 32], strides = [1, 1]} : vector<8x96xf32> to vector<8x32xf32>
    %254 = arith.mulf %252, %218 : vector<8x32xf32>
    %255 = arith.mulf %251, %250 : vector<8x32xf32>
    %256 = arith.addf %254, %255 : vector<8x32xf32>
    %257 = math.tanh %256 : vector<8x32xf32>
    %258 = arith.mulf %253, %257 : vector<8x32xf32>
    %cst_54 = arith.constant dense<0.000000e+00> : vector<8x128xf32>
    %259 = tpu.matmul %258, %3, %cst_54 {dimension_numbers = #tpu.dot_dimension_numbers<[1], [0], [0], [1], [0, 0, 1, 1], [], []>} : vector<8x32xf32>, vector<32x128xf32>, vector<8x128xf32> -> vector<8x128xf32>
    %260 = arith.addf %259, %240 : vector<8x128xf32>
    %261 = math.tanh %260 : vector<8x128xf32>
    %262 = vector.extract_strided_slice %261 {offsets = [0, 0], sizes = [8, 96], strides = [1, 1]} : vector<8x128xf32> to vector<8x96xf32>
    %cst_55 = arith.constant 5.000000e-01 : f32
    %263 = vector.broadcast %cst_55 : f32 to vector<8x96xf32>
    %264 = arith.mulf %263, %262 : vector<8x96xf32>
    %cst_56 = arith.constant 5.000000e-01 : f32
    %265 = vector.broadcast %cst_56 : f32 to vector<8x96xf32>
    %266 = arith.addf %264, %265 : vector<8x96xf32>
    %267 = vector.extract_strided_slice %261 {offsets = [0, 96], sizes = [8, 32], strides = [1, 1]} : vector<8x128xf32> to vector<8x32xf32>
    %268 = vector.extract_strided_slice %266 {offsets = [0, 0], sizes = [8, 32], strides = [1, 1]} : vector<8x96xf32> to vector<8x32xf32>
    %269 = vector.extract_strided_slice %266 {offsets = [0, 32], sizes = [8, 32], strides = [1, 1]} : vector<8x96xf32> to vector<8x32xf32>
    %270 = vector.extract_strided_slice %266 {offsets = [0, 64], sizes = [8, 32], strides = [1, 1]} : vector<8x96xf32> to vector<8x32xf32>
    %271 = arith.mulf %269, %235 : vector<8x32xf32>
    %272 = arith.mulf %268, %267 : vector<8x32xf32>
    %273 = arith.addf %271, %272 : vector<8x32xf32>
    %274 = math.tanh %273 : vector<8x32xf32>
    %275 = arith.mulf %270, %274 : vector<8x32xf32>
    %cst_57 = arith.constant dense<0.000000e+00> : vector<8x128xf32>
    %276 = tpu.matmul %275, %4, %cst_57 {dimension_numbers = #tpu.dot_dimension_numbers<[1], [0], [0], [1], [0, 0, 1, 1], [], []>} : vector<8x32xf32>, vector<32x128xf32>, vector<8x128xf32> -> vector<8x128xf32>
    %277 = vector.broadcast %5 : vector<1x128xf32> to vector<8x128xf32>
    %278 = arith.addf %276, %277 : vector<8x128xf32>
    %279 = vector.extract_strided_slice %9 {offsets = [56, 0], sizes = [8, 128], strides = [1, 1]} : vector<64x128xf32> to vector<8x128xf32>
    %cst_58 = arith.constant dense<0.000000e+00> : vector<8x128xf32>
    %280 = tpu.matmul %258, %1, %cst_58 {dimension_numbers = #tpu.dot_dimension_numbers<[1], [0], [0], [1], [0, 0, 1, 1], [], []>} : vector<8x32xf32>, vector<32x128xf32>, vector<8x128xf32> -> vector<8x128xf32>
    %281 = arith.addf %279, %280 : vector<8x128xf32>
    %282 = math.tanh %281 : vector<8x128xf32>
    %283 = vector.extract_strided_slice %282 {offsets = [0, 0], sizes = [8, 96], strides = [1, 1]} : vector<8x128xf32> to vector<8x96xf32>
    %cst_59 = arith.constant 5.000000e-01 : f32
    %284 = vector.broadcast %cst_59 : f32 to vector<8x96xf32>
    %285 = arith.mulf %284, %283 : vector<8x96xf32>
    %cst_60 = arith.constant 5.000000e-01 : f32
    %286 = vector.broadcast %cst_60 : f32 to vector<8x96xf32>
    %287 = arith.addf %285, %286 : vector<8x96xf32>
    %288 = vector.extract_strided_slice %282 {offsets = [0, 96], sizes = [8, 32], strides = [1, 1]} : vector<8x128xf32> to vector<8x32xf32>
    %289 = vector.extract_strided_slice %287 {offsets = [0, 0], sizes = [8, 32], strides = [1, 1]} : vector<8x96xf32> to vector<8x32xf32>
    %290 = vector.extract_strided_slice %287 {offsets = [0, 32], sizes = [8, 32], strides = [1, 1]} : vector<8x96xf32> to vector<8x32xf32>
    %291 = vector.extract_strided_slice %287 {offsets = [0, 64], sizes = [8, 32], strides = [1, 1]} : vector<8x96xf32> to vector<8x32xf32>
    %292 = arith.mulf %290, %256 : vector<8x32xf32>
    %293 = arith.mulf %289, %288 : vector<8x32xf32>
    %294 = arith.addf %292, %293 : vector<8x32xf32>
    %295 = math.tanh %294 : vector<8x32xf32>
    %296 = arith.mulf %291, %295 : vector<8x32xf32>
    %cst_61 = arith.constant dense<0.000000e+00> : vector<8x128xf32>
    %297 = tpu.matmul %296, %3, %cst_61 {dimension_numbers = #tpu.dot_dimension_numbers<[1], [0], [0], [1], [0, 0, 1, 1], [], []>} : vector<8x32xf32>, vector<32x128xf32>, vector<8x128xf32> -> vector<8x128xf32>
    %298 = arith.addf %297, %278 : vector<8x128xf32>
    %299 = math.tanh %298 : vector<8x128xf32>
    %300 = vector.extract_strided_slice %299 {offsets = [0, 0], sizes = [8, 96], strides = [1, 1]} : vector<8x128xf32> to vector<8x96xf32>
    %cst_62 = arith.constant 5.000000e-01 : f32
    %301 = vector.broadcast %cst_62 : f32 to vector<8x96xf32>
    %302 = arith.mulf %301, %300 : vector<8x96xf32>
    %cst_63 = arith.constant 5.000000e-01 : f32
    %303 = vector.broadcast %cst_63 : f32 to vector<8x96xf32>
    %304 = arith.addf %302, %303 : vector<8x96xf32>
    %305 = vector.extract_strided_slice %299 {offsets = [0, 96], sizes = [8, 32], strides = [1, 1]} : vector<8x128xf32> to vector<8x32xf32>
    %306 = vector.extract_strided_slice %304 {offsets = [0, 0], sizes = [8, 32], strides = [1, 1]} : vector<8x96xf32> to vector<8x32xf32>
    %307 = vector.extract_strided_slice %304 {offsets = [0, 32], sizes = [8, 32], strides = [1, 1]} : vector<8x96xf32> to vector<8x32xf32>
    %308 = vector.extract_strided_slice %304 {offsets = [0, 64], sizes = [8, 32], strides = [1, 1]} : vector<8x96xf32> to vector<8x32xf32>
    %309 = arith.mulf %307, %273 : vector<8x32xf32>
    %310 = arith.mulf %306, %305 : vector<8x32xf32>
    %311 = arith.addf %309, %310 : vector<8x32xf32>
    %312 = math.tanh %311 : vector<8x32xf32>
    %313 = arith.mulf %308, %312 : vector<8x32xf32>
    %314 = vector.extract_strided_slice %296 {offsets = [0, 0], sizes = [2, 32], strides = [1, 1]} : vector<8x32xf32> to vector<2x32xf32>
    %c0_64 = arith.constant 0 : index
    %c0_65 = arith.constant 0 : index
    %c0_66 = arith.constant 0 : index
    %c0_67 = arith.constant 0 : index
    %315 = vector.load %arg2[%c0_64, %c0_65, %c0_66, %c0_67] : memref<2x2x2x32xf32, #tpu.memory_space<vmem>>, vector<1x1x2x32xf32>
    %316 = vector.shape_cast %315 : vector<1x1x2x32xf32> to vector<2x32xf32>
    %317 = vector.shape_cast %314 : vector<2x32xf32> to vector<1x1x2x32xf32>
    tpu.vector_store %arg2[%c0_64, %c0_65, %c0_66, %c0_67], %317 {strides = array<i32>} : memref<2x2x2x32xf32, #tpu.memory_space<vmem>>, vector<1x1x2x32xf32>,
    %318 = vector.extract_strided_slice %313 {offsets = [0, 0], sizes = [2, 32], strides = [1, 1]} : vector<8x32xf32> to vector<2x32xf32>
    %c0_68 = arith.constant 0 : index
    %c1 = arith.constant 1 : index
    %c0_69 = arith.constant 0 : index
    %c0_70 = arith.constant 0 : index
    %319 = vector.load %arg2[%c0_68, %c1, %c0_69, %c0_70] : memref<2x2x2x32xf32, #tpu.memory_space<vmem>>, vector<1x1x2x32xf32>
    %320 = vector.shape_cast %319 : vector<1x1x2x32xf32> to vector<2x32xf32>
    %321 = vector.shape_cast %318 : vector<2x32xf32> to vector<1x1x2x32xf32>
    tpu.vector_store %arg2[%c0_68, %c1, %c0_69, %c0_70], %321 {strides = array<i32>} : memref<2x2x2x32xf32, #tpu.memory_space<vmem>>, vector<1x1x2x32xf32>,
    %322 = vector.extract_strided_slice %294 {offsets = [0, 0], sizes = [2, 32], strides = [1, 1]} : vector<8x32xf32> to vector<2x32xf32>
    %c1_71 = arith.constant 1 : index
    %c0_72 = arith.constant 0 : index
    %c0_73 = arith.constant 0 : index
    %c0_74 = arith.constant 0 : index
    %323 = vector.load %arg2[%c1_71, %c0_72, %c0_73, %c0_74] : memref<2x2x2x32xf32, #tpu.memory_space<vmem>>, vector<1x1x2x32xf32>
    %324 = vector.shape_cast %323 : vector<1x1x2x32xf32> to vector<2x32xf32>
    %325 = vector.shape_cast %322 : vector<2x32xf32> to vector<1x1x2x32xf32>
    tpu.vector_store %arg2[%c1_71, %c0_72, %c0_73, %c0_74], %325 {strides = array<i32>} : memref<2x2x2x32xf32, #tpu.memory_space<vmem>>, vector<1x1x2x32xf32>,
    %326 = vector.extract_strided_slice %311 {offsets = [0, 0], sizes = [2, 32], strides = [1, 1]} : vector<8x32xf32> to vector<2x32xf32>
    %c1_75 = arith.constant 1 : index
    %c1_76 = arith.constant 1 : index
    %c0_77 = arith.constant 0 : index
    %c0_78 = arith.constant 0 : index
    %327 = vector.load %arg2[%c1_75, %c1_76, %c0_77, %c0_78] : memref<2x2x2x32xf32, #tpu.memory_space<vmem>>, vector<1x1x2x32xf32>
    %328 = vector.shape_cast %327 : vector<1x1x2x32xf32> to vector<2x32xf32>
    %329 = vector.shape_cast %326 : vector<2x32xf32> to vector<1x1x2x32xf32>
    tpu.vector_store %arg2[%c1_75, %c1_76, %c0_77, %c0_78], %329 {strides = array<i32>} : memref<2x2x2x32xf32, #tpu.memory_space<vmem>>, vector<1x1x2x32xf32>,
    return
  }
}

</mosaic_0001>

<bundles_post_ra>
// kernel: tpu_custom_call.1
= control target key start
LH: loop header
LB: loop body
LE: loop exit
PB: predicated region body
PF: predicated region fallthrough
CT: control target
= control target key end

     0   :  { %7 = vsyncpa [#allocation3], 0  ;;  %s3315_s0 = inlined_call_operand.vmem [shape: f32[64,8], index: 0, kind: input, shape index: {}]   ;;  %s3316_s1 = inlined_call_operand.hbm [shape: f32[120,128], index: 1, kind: input, shape index: {}]   ;;  %s3317_s2 = inlined_call_operand.hbm [shape: f32[2,2,2,32], index: 2, kind: output, shape index: {}]  }
   0x1   :  { %8 = vsyncpa [#allocation4], 0  ;;  %s2947_s9 = smov [#allocation2]   ;;  %s2899_s13 = scalar_lea.hbm %s3316_s1, 1920 }
   0x2   :  { %s16_s10 = sshll.u32 %s2947_s9, 4  ;;  %p2900_p0 = scmp.ne.s32.totalorder %s3316_s1, %s2899_s13  ;;  %s17_s10 = int_to_ptr.vmem [resolvable:$true] %s16_s10 }
   0x3   :  { %p2903_p1 = scmp.lt.u32.totalorder %s2899_s13, %s3316_s1 }
   0x5   :  { %p2905_p2 = pnand %p2903_p1, %p2900_p0 }
   0x7   :  { %2908 = shalt.err (!%p2905_p2)
}
   0x8   :  { %s2909_s18 = scalar_lea.vmem %s17_s10, 1920  ;;  %p2914_p4 = scmp.lt.s32.totalorder %s17_s10, %s17_s10 }
   0x9   :  { %p2910_p3 = scmp.ne.s32.totalorder %s17_s10, %s2909_s18  ;;  %p2915_p5 = scmp.lt.s32.totalorder %s2909_s18, %s2909_s18 }
   0xb   :  { %p2916_p6 = por %p2915_p5, %p2914_p4 }
   0xd   :  { %p2917_p7 = pnand %p2916_p6, %p2910_p3 }
   0xf   :  { %2920 = shalt.err (!%p2917_p7)
}
  0x10   :  { %s2948_s19 = smov 128   ;;  %s2949_s20 = smov 8  }
  0x11   :  { %22 = dma.hbm_to_vmem [thread:$0]  %s3316_s1, 1920, %s17_s10, [#allocation3], %s2948_s19, %s2948_s19, %s2949_s20  }
  0x12   :  { %2943 = dma.done.wait [#allocation3], 1920  }
  0x13   :  { %2944 = vsyncadd [#allocation3], 4294965376  ;;  %v2950_v0 = vmov 0.0|0.0   ;;  %vm2951_vm0 = vmmov 0   ;;  %v2952_v1 = vmov 0.0   ;;  %vm53_vm1 = vcmask 64512  }
  0x14   :  { %2665 = vmatprep.subr.bf16.mxu1 %v2950_v0  ;;  %2420 = vmatprep.mubr.msk.f32.mxu1 %vm2951_vm0, %v2952_v1  ;;  %v27_v2 = vld [vmem:[#allocation2 + $0x8] sm:$0xff]  ;;  %v28_v3 = vld [vmem:[#allocation2 + $0x10] sm:$0xff]  ;;  %v26_v4 = vld [vmem:[#allocation2] sm:$0xff]  ;;  %s2953_s26 = smov 32   ;;  %s2954_s27 = smov 64   ;;  %vm187_vm2 = vcmask 261120  }
  0x15   :  { %v2988_v5 = vpack.c.bf16 %v28_v3, %v27_v2  ;;  %2398 = vmatprep.subr.mxu0 %v26_v4  ;;  %v41_v6 = vld [vmem:[%s3315_s0] sm:$0xff]  ;;  %v42_v7 = vld [vmem:[%s3315_s0 + $0x8] sm:$0xff]  ;;  %v29_v8 = vld [vmem:[#allocation2 + $0x18] sm:$0xff]  ;;  %vm2205_vm3 = vcmask 254976   ;;  %s2956_s12 = smov [#allocation5]  }
  0x16   :  { %2399 = vmatpush3.msra.mxu0 %v26_v4  ;;  %2400 = vmatprep.mubr.msk.f32.mxu0 %vm53_vm1, %v41_v6  ;;  %v30_v9 = vld [vmem:[#allocation2 + $0x20] sm:$0xff]  ;;  %v3008_v12 = vld [vmem:[#allocation2 + $0x28] ss:$0 sm:$0xff]  ;;  %v32_v26 = vld [vmem:[#allocation2 + $0x30] sm:$0xff]  ;;  %s2230_s13 = sshll.u32 %s2956_s12, 4  ;;  %s2231_s13 = int_to_ptr.vmem [resolvable:$true] %s2230_s13 }
  0x17   :  { %2667 = vmatpush3.bf16.msra.mxu1 %v2988_v5  ;;  %2401 = vmatmul.mubr.msk.f32.vlgmr.msra.gmra.mrb[0].mxu0 %vm53_vm1, %v42_v7  ;;  %v2999_v10 = vpack.c.bf16 %v30_v9, %v29_v8  ;;  %v33_v27 = vld [vmem:[#allocation2 + $0x38] sm:$0xff]  ;;  %v34_v28 = vld [vmem:[#allocation2 + $0x40] sm:$0xff]  ;;  %v35_v30 = vld [vmem:[#allocation2 + $0x48] sm:$0xff]  ;;  %s2921_s14 = scalar_lea.vmem %s2231_s13, 128  ;;  %p2926_p9 = scmp.lt.s32.totalorder %s2231_s13, %s2231_s13 }
  0x18   :  { %2668 = vmatprep.subr.bf16.mxu1 %v2950_v0  ;;  %2677 = vmatprep.subr.bf16.mxu0 %v2950_v0  ;;  %v3013_v29 = vpack.c.bf16 %v33_v27, %v32_v26  ;;  %v3016_v31 = vpack.c.bf16 %v35_v30, %v34_v28  ;;  %v3033_v36 = vld [vmem:[#allocation2 + $0x70] ss:$0 sm:$0xff]  ;;  %v37_v61 = vld [vmem:[#allocation2 + $0x58] sm:$0xff]  ;;  %v45_v3 = vld [vmem:[%s3315_s0 + $0x20] sm:$0xff]  ;;  %p2922_p8 = scmp.ne.s32.totalorder %s2231_s13, %s2921_s14  ;;  %p2927_p10 = scmp.lt.s32.totalorder %s2921_s14, %s2921_s14 }
  0x19   :  { %v36_v60 = vld [vmem:[#allocation2 + $0x50] sm:$0xff]  ;;  %v44_v2 = vld [vmem:[%s3315_s0 + $0x18] sm:$0xff]  ;;  %v38_v6 = vld [vmem:[#allocation2 + $0x60] sm:$0xff] }
  0x1a   :  { %v43_v62 = vld [vmem:[%s3315_s0 + $0x10] sm:$0xff]  ;;  %v3050_v63 = vpack.c.bf16 %v37_v61, %v36_v60  ;;  %v39_v7 = vld [vmem:[#allocation2 + $0x68] sm:$0xff]  ;;  %p2928_p11 = por %p2927_p10, %p2926_p9 }
  0x1b   :  { %2670 = vmatpush3.bf16.msra.mxu1 %v2999_v10  ;;  %2403 = vmatprep.mubr.msk.f32.mxu0 %vm53_vm1, %v43_v62  ;;  %v46_v8 = vld [vmem:[%s3315_s0 + $0x28] sm:$0xff]  ;;  %v3065_v9 = vpack.c.bf16 %v39_v7, %v38_v6 }
  0x1c   :  { %2671 = vmatprep.subr.bf16.mxu1 %v2950_v0  ;;  %2404 = vmatmul.mubr.msk.f32.gmra.mrb[2].mxu0 %vm53_vm1, %v44_v2  ;;  %p2929_p12 = pnand %p2928_p11, %p2922_p8 }
  0x1d   :  { %2679 = vmatpush3.bf16.msra.mxu0 %v3050_v63  ;;  %2406 = vmatprep.mubr.msk.f32.mxu0 %vm53_vm1, %v45_v3 }
  0x1e   :  { %2421 = vmatmul.mubr.f32.vlgmr.msra.gmra.mrb[0].mxu1 %v2952_v1  ;;  %2680 = vmatprep.subr.bf16.mxu0 %v2950_v0 }
  0x1f   :  { %2431 = vmatprep.mubr.msk.f32.mxu1 %vm2951_vm0, %v2952_v1  ;;  %2673 = vmatpush3.bf16.msra.mxu1 %v3013_v29 }
  0x20   :  { %2674 = vmatprep.subr.bf16.mxu1 %v2950_v0  ;;  %2407 = vmatmul.mubr.msk.f32.gmra.mrb[4].mxu0 %vm53_vm1, %v46_v8 }
  0x21   :  { %2682 = vmatpush3.bf16.msra.mxu0 %v3065_v9 }
  0x22   :  { %2689 = vmatprep.subr.bf16.mxu0 %v2950_v0 }
  0x23   :  { %2676 = vmatpush3.bf16.msra.mxu1 %v3016_v31 }
  0x24   :  { %2683 = vmatprep.subr.bf16.mxu1 %v2950_v0 }
  0xea   :  { %v2402_v11 = vpop.f32.mrb[0].mxu0 }
  0xeb   :  { %v144_v13 = vpop.f32.mrb[1].mxu0  ;;  %v150_v40 = vadd.f32 %v2402_v11, %v3008_v12  ;;  %v47_v11 = vld [vmem:[%s3315_s0 + $0x30] sm:$0xff] }
  0xec   :  { %v145_v14 = vadd.f32 %v3008_v12, %v144_v13  ;;  %2409 = vmatprep.mubr.msk.f32.mxu0 %vm53_vm1, %v47_v11  ;;  %v48_v13 = vld [vmem:[%s3315_s0 + $0x38] sm:$0xff]  ;;  %s2955_s0 = smov 96  }
  0xed   :  { %2410 = vmatmul.mubr.msk.f32.gmra.mrb[6].mxu0 %vm53_vm1, %v48_v13 }
  0xee   :  { %2442 = vmatprep.mubr.msk.f32.mxu0 %vm2951_vm0, %v2952_v1 }
  0xf1   :  { %v257_v15 = vpop.f32.mrb[0].mxu1 }
  0xf2   :  { %v261_v16 = vadd.f32 %v257_v15, %v145_v14  ;;  %v2422_v17 = vpop.f32.mrb[1].mxu1 }
  0xf4   :  { %2835 = vtanh.f32 %v261_v16 }
  0xfe   :  { %v2836_v18 = vpop.eup %2835 }
  0xff   :  { %267 = vrot.lane.b32.xlu0 %v2836_v18, %s2953_s26  ;;  %v263_v19 = vmul.f32 0.5, %v2836_v18 }
 0x101   :  { %v264_v20 = vadd.f32 0.5, %v263_v19  ;;  %v3089_v19 = vpop.f32.mrb[2].mxu0 }
 0x102   :  { %v160_v3 = vadd.f32 %v3089_v19, %v3008_v12 }
 0x103   :  { %v265_v23 = vmul.f32 0.0, %v264_v20 }
 0x171   :  { %v268_v21 = vpop.permute.xlu0 %267 }
 0x172   :  { %v270_v22 = vmul.f32 %v268_v21, %v264_v20 }
 0x174   :  { %272 = vrot.lane.b32.xlu0 %v270_v22, %s2953_s26 }
 0x1e6   :  { %v273_v24 = vpop.permute.xlu0 %272 }
 0x1e7   :  { %v275_v25 = vadd.f32 %v273_v24, %v265_v23 }
 0x1e9   :  { %2837 = vtanh.f32 %v275_v25 }
 0x1f3   :  { %v2838_v32 = vpop.eup %2837 }
 0x1f4   :  { %278 = vrot.lane.b32.xlu1 %v2838_v32, %s2953_s26 }
 0x266   :  { %v279_v33 = vpop.permute.xlu1 %278 }
 0x267   :  { %v281_v34 = vmul.f32 %v279_v33, %v264_v20  ;;  %v154_v20 = vpop.f32.mrb[3].mxu0 }
 0x268   :  { %v3091_v21 = vpop.f32.mrb[4].mxu0  ;;  %v155_v32 = vadd.f32 %v3008_v12, %v154_v20 }
 0x269   :  { %283 = vrot.lane.b32.xlu1 %v281_v34, %s2954_s27  ;;  %v3093_v22 = vpop.f32.mrb[5].mxu0 }
 0x26a   :  { %v3095_v23 = vpop.f32.mrb[6].mxu0 }
 0x26b   :  { %v3097_v24 = vpop.f32.mrb[7].mxu0 }
 0x2db   :  { %v284_v35 = vpop.permute.xlu1 %283 }
 0x2dc   :  { %2432 = vmatmul.mubr.msk.f32.vlgmr.msra.gmra.mrb[2].mxu1 %vm187_vm2, %v284_v35 }
 0x2dd   :  { %2685 = vmatpush3.bf16.msra.mxu1 %v2988_v5  ;;  %2453 = vmatprep.mubr.msk.f32.mxu1 %vm2951_vm0, %v2952_v1 }
 0x2de   :  { %2686 = vmatprep.subr.bf16.mxu1 %v2950_v0 }
 0x2e1   :  { %2688 = vmatpush3.bf16.msra.mxu1 %v2999_v10 }
 0x2e2   :  { %2695 = vmatprep.subr.bf16.mxu1 %v2950_v0 }
 0x2e4   :  { %2454 = vmatmul.mubr.msk.f32.vlgmr.msra.gmra.mrb[4].mxu1 %vm187_vm2, %v284_v35 }
 0x2e5   :  { %2475 = vmatprep.mubr.msk.f32.mxu1 %vm2951_vm0, %v2952_v1  ;;  %2697 = vmatpush3.bf16.msra.mxu1 %v3050_v63 }
 0x2e6   :  { %2698 = vmatprep.subr.bf16.mxu1 %v2950_v0 }
 0x2e9   :  { %2700 = vmatpush3.bf16.msra.mxu1 %v3065_v9 }
 0x2ea   :  { %2707 = vmatprep.subr.bf16.mxu1 %v2950_v0 }
 0x3af   :  { %v353_v37 = vpop.f32.mrb[2].mxu1 }
 0x3b0   :  { %v354_v38 = vadd.f32 %v3033_v36, %v353_v37  ;;  %v2433_v39 = vpop.f32.mrb[3].mxu1 }
 0x3b2   :  { %2839 = vtanh.f32 %v354_v38 }
 0x3b7   :  { %v518_v41 = vpop.f32.mrb[4].mxu1 }
 0x3b8   :  { %v522_v42 = vadd.f32 %v518_v41, %v150_v40  ;;  %v2455_v43 = vpop.f32.mrb[5].mxu1 }
 0x3ba   :  { %2841 = vtanh.f32 %v522_v42 }
 0x3bc   :  { %v2840_v44 = vpop.eup %2839 }
 0x3bd   :  { %362 = vrot.lane.b32.xlu0 %v2840_v44, %s2953_s26  ;;  %v358_v46 = vmul.f32 0.5, %v2840_v44 }
 0x3bf   :  { %v359_v47 = vadd.f32 0.5, %v358_v46 }
 0x3c1   :  { %v360_v54 = vmul.f32 0.0, %v359_v47 }
 0x3c4   :  { %v2842_v45 = vpop.eup %2841 }
 0x3c5   :  { %528 = vrot.lane.b32.xlu1 %v2842_v45, %s2953_s26  ;;  %v524_v50 = vmul.f32 0.5, %v2842_v45 }
 0x3c7   :  { %v525_v51 = vadd.f32 0.5, %v524_v50 }
 0x3c9   :  { %v526_v57 = vmul.f32 %v525_v51, %v275_v25 }
 0x42f   :  { %v363_v48 = vpop.permute.xlu0 %362 }
 0x430   :  { %v365_v49 = vmul.f32 %v363_v48, %v359_v47 }
 0x432   :  { %367 = vrot.lane.b32.xlu0 %v365_v49, %s2953_s26 }
 0x437   :  { %v529_v52 = vpop.permute.xlu1 %528 }
 0x438   :  { %v531_v53 = vmul.f32 %v529_v52, %v525_v51 }
 0x43a   :  { %533 = vrot.lane.b32.xlu1 %v531_v53, %s2953_s26 }
 0x4a4   :  { %v368_v55 = vpop.permute.xlu0 %367 }
 0x4a5   :  { %v3041_v56 = vadd.f32 %v368_v55, %v360_v54 }
 0x4a7   :  { %2843 = vtanh.f32 %v3041_v56 }
 0x4ac   :  { %v534_v58 = vpop.permute.xlu1 %533 }
 0x4ad   :  { %v3044_v59 = vadd.f32 %v534_v58, %v526_v57 }
 0x4af   :  { %2845 = vtanh.f32 %v3044_v59 }
 0x4b1   :  { %v2844_v4 = vpop.eup %2843 }
 0x4b2   :  { %373 = vrot.lane.b32.xlu0 %v2844_v4, %s2953_s26 }
 0x4b9   :  { %v2846_v14 = vpop.eup %2845 }
 0x4ba   :  { %539 = vrot.lane.b32.xlu1 %v2846_v14, %s2953_s26 }
 0x524   :  { %v374_v15 = vpop.permute.xlu0 %373 }
 0x525   :  { %v376_v16 = vmul.f32 %v374_v15, %v359_v47 }
 0x527   :  { %378 = vrot.lane.b32.xlu0 %v376_v16, %s2954_s27 }
 0x52c   :  { %v540_v17 = vpop.permute.xlu1 %539 }
 0x52d   :  { %v542_v18 = vmul.f32 %v540_v17, %v525_v51 }
 0x52f   :  { %544 = vrot.lane.b32.xlu1 %v542_v18, %s2954_s27 }
 0x599   :  { %v379_v25 = vpop.permute.xlu0 %378 }
 0x59a   :  { %2443 = vmatmul.mubr.msk.f32.vlgmr.msra.gmra.mrb[8].mxu0 %vm187_vm2, %v379_v25 }
 0x59b   :  { %2691 = vmatpush3.bf16.msra.mxu0 %v3013_v29  ;;  %2464 = vmatprep.mubr.msk.f32.mxu0 %vm2951_vm0, %v2952_v1 }
 0x59c   :  { %2692 = vmatprep.subr.bf16.mxu0 %v2950_v0 }
 0x59f   :  { %2694 = vmatpush3.bf16.msra.mxu0 %v3016_v31 }
 0x5a0   :  { %2701 = vmatprep.subr.bf16.mxu0 %v2950_v0 }
 0x5a1   :  { %v545_v26 = vpop.permute.xlu1 %544 }
 0x5a2   :  { %2465 = vmatmul.mubr.msk.f32.vlgmr.msra.gmra.mrb[8].mxu0 %vm187_vm2, %v545_v26 }
 0x5a3   :  { %2703 = vmatpush3.bf16.msra.mxu0 %v2988_v5  ;;  %2486 = vmatprep.mubr.msk.f32.mxu0 %vm2951_vm0, %v2952_v1 }
 0x5a4   :  { %2704 = vmatprep.subr.bf16.mxu0 %v2950_v0 }
 0x5a7   :  { %2706 = vmatpush3.bf16.msra.mxu0 %v2999_v10 }
 0x5a8   :  { %2713 = vmatprep.subr.bf16.mxu0 %v2950_v0 }
 0x5aa   :  { %2487 = vmatmul.mubr.msk.f32.vlgmr.msra.gmra.mrb[10].mxu0 %vm187_vm2, %v545_v26 }
 0x5ab   :  { %2715 = vmatpush3.bf16.msra.mxu0 %v3050_v63  ;;  %2508 = vmatprep.mubr.msk.f32.mxu0 %vm2951_vm0, %v2952_v1 }
 0x5ac   :  { %2716 = vmatprep.subr.bf16.mxu0 %v2950_v0 }
 0x5af   :  { %2718 = vmatpush3.bf16.msra.mxu0 %v3065_v9 }
 0x5b0   :  { %2725 = vmatprep.subr.bf16.mxu0 %v2950_v0 }
 0x675   :  { %v614_v27 = vpop.f32.mrb[8].mxu0 }
 0x676   :  { %v2803_v28 = vadd.f32 %v3033_v36, %v614_v27  ;;  %v2466_v30 = vpop.f32.mrb[9].mxu0 }
 0x678   :  { %2847 = vtanh.f32 %v2803_v28 }
 0x67d   :  { %v779_v33 = vpop.f32.mrb[10].mxu0 }
 0x67e   :  { %v783_v34 = vadd.f32 %v779_v33, %v155_v32  ;;  %v2488_v35 = vpop.f32.mrb[11].mxu0 }
 0x680   :  { %2849 = vtanh.f32 %v783_v34 }
 0x682   :  { %v2848_v37 = vpop.eup %2847 }
 0x683   :  { %623 = vrot.lane.b32.xlu0 %v2848_v37, %s2953_s26  ;;  %v619_v39 = vmul.f32 0.5, %v2848_v37 }
 0x685   :  { %v620_v40 = vadd.f32 0.5, %v619_v39 }
 0x687   :  { %v621_v47 = vmul.f32 %v620_v40, %v3041_v56 }
 0x68a   :  { %v2850_v38 = vpop.eup %2849 }
 0x68b   :  { %789 = vrot.lane.b32.xlu1 %v2850_v38, %s2953_s26  ;;  %v785_v43 = vmul.f32 0.5, %v2850_v38 }
 0x68d   :  { %v786_v44 = vadd.f32 0.5, %v785_v43 }
 0x68f   :  { %v787_v50 = vmul.f32 %v786_v44, %v3044_v59 }
 0x6f5   :  { %v624_v41 = vpop.permute.xlu0 %623 }
 0x6f6   :  { %v626_v42 = vmul.f32 %v624_v41, %v620_v40 }
 0x6f8   :  { %628 = vrot.lane.b32.xlu0 %v626_v42, %s2953_s26 }
 0x6fd   :  { %v790_v45 = vpop.permute.xlu1 %789 }
 0x6fe   :  { %v792_v46 = vmul.f32 %v790_v45, %v786_v44  ;;  %v165_v45 = vadd.f32 %v3008_v12, %v3093_v22 }
 0x700   :  { %794 = vrot.lane.b32.xlu1 %v792_v46, %s2953_s26 }
 0x76a   :  { %v629_v48 = vpop.permute.xlu0 %628 }
 0x76b   :  { %v631_v49 = vadd.f32 %v629_v48, %v621_v47 }
 0x76d   :  { %2851 = vtanh.f32 %v631_v49 }
 0x772   :  { %v795_v51 = vpop.permute.xlu1 %794 }
 0x773   :  { %v797_v52 = vadd.f32 %v795_v51, %v787_v50 }
 0x775   :  { %2853 = vtanh.f32 %v797_v52 }
 0x777   :  { %v2852_v53 = vpop.eup %2851 }
 0x778   :  { %634 = vrot.lane.b32.xlu0 %v2852_v53, %s2953_s26 }
 0x77f   :  { %v2854_v54 = vpop.eup %2853 }
 0x780   :  { %800 = vrot.lane.b32.xlu1 %v2854_v54, %s2953_s26 }
 0x7ea   :  { %v635_v55 = vpop.permute.xlu0 %634 }
 0x7eb   :  { %v637_v57 = vmul.f32 %v635_v55, %v620_v40 }
 0x7ed   :  { %639 = vrot.lane.b32.xlu0 %v637_v57, %s2954_s27 }
 0x7f2   :  { %v801_v58 = vpop.permute.xlu1 %800 }
 0x7f3   :  { %v803_v56 = vmul.f32 %v801_v58, %v786_v44 }
 0x7f5   :  { %805 = vrot.lane.b32.xlu1 %v803_v56, %s2954_s27 }
 0x85f   :  { %v640_v60 = vpop.permute.xlu0 %639 }
 0x860   :  { %2476 = vmatmul.mubr.msk.f32.vlgmr.msra.gmra.mrb[6].mxu1 %vm187_vm2, %v640_v60 }
 0x861   :  { %2709 = vmatpush3.bf16.msra.mxu1 %v3013_v29  ;;  %2497 = vmatprep.mubr.msk.f32.mxu1 %vm2951_vm0, %v2952_v1 }
 0x862   :  { %2710 = vmatprep.subr.bf16.mxu1 %v2950_v0 }
 0x865   :  { %2712 = vmatpush3.bf16.msra.mxu1 %v3016_v31 }
 0x866   :  { %2719 = vmatprep.subr.bf16.mxu1 %v2950_v0 }
 0x867   :  { %v806_v59 = vpop.permute.xlu1 %805 }
 0x868   :  { %2498 = vmatmul.mubr.msk.f32.vlgmr.msra.gmra.mrb[6].mxu1 %vm187_vm2, %v806_v59 }
 0x869   :  { %2721 = vmatpush3.bf16.msra.mxu1 %v2988_v5  ;;  %2519 = vmatprep.mubr.msk.f32.mxu1 %vm2951_vm0, %v2952_v1 }
 0x86a   :  { %2722 = vmatprep.subr.bf16.mxu1 %v2950_v0 }
 0x86d   :  { %2724 = vmatpush3.bf16.msra.mxu1 %v2999_v10 }
 0x86e   :  { %2731 = vmatprep.subr.bf16.mxu1 %v2950_v0 }
 0x870   :  { %2520 = vmatmul.mubr.msk.f32.vlgmr.msra.gmra.mrb[8].mxu1 %vm187_vm2, %v806_v59 }
 0x871   :  { %2733 = vmatpush3.bf16.msra.mxu1 %v3050_v63  ;;  %2541 = vmatprep.mubr.msk.f32.mxu1 %vm2951_vm0, %v2952_v1 }
 0x872   :  { %2734 = vmatprep.subr.bf16.mxu1 %v2950_v0 }
 0x875   :  { %2736 = vmatpush3.bf16.msra.mxu1 %v3065_v9 }
 0x876   :  { %2743 = vmatprep.subr.bf16.mxu1 %v2950_v0 }
 0x93b   :  { %v875_v61 = vpop.f32.mrb[6].mxu1 }
 0x93c   :  { %v2804_v62 = vadd.f32 %v3033_v36, %v875_v61  ;;  %v2499_v2 = vpop.f32.mrb[7].mxu1 }
 0x93e   :  { %2855 = vtanh.f32 %v2804_v62 }
 0x943   :  { %v1040_v4 = vpop.f32.mrb[8].mxu1 }
 0x944   :  { %v1044_v6 = vadd.f32 %v1040_v4, %v160_v3  ;;  %v2521_v7 = vpop.f32.mrb[9].mxu1 }
 0x946   :  { %2857 = vtanh.f32 %v1044_v6 }
 0x948   :  { %v2856_v8 = vpop.eup %2855 }
 0x949   :  { %884 = vrot.lane.b32.xlu0 %v2856_v8, %s2953_s26  ;;  %v880_v13 = vmul.f32 0.5, %v2856_v8 }
 0x94b   :  { %v881_v14 = vadd.f32 0.5, %v880_v13 }
 0x94d   :  { %v882_v25 = vmul.f32 %v881_v14, %v631_v49 }
 0x950   :  { %v2858_v11 = vpop.eup %2857 }
 0x951   :  { %1050 = vrot.lane.b32.xlu1 %v2858_v11, %s2953_s26  ;;  %v1046_v17 = vmul.f32 0.5, %v2858_v11 }
 0x953   :  { %v1047_v18 = vadd.f32 0.5, %v1046_v17 }
 0x955   :  { %v1048_v28 = vmul.f32 %v1047_v18, %v797_v52 }
 0x9bb   :  { %v885_v15 = vpop.permute.xlu0 %884 }
 0x9bc   :  { %v887_v16 = vmul.f32 %v885_v15, %v881_v14 }
 0x9be   :  { %889 = vrot.lane.b32.xlu0 %v887_v16, %s2953_s26 }
 0x9c3   :  { %v1051_v20 = vpop.permute.xlu1 %1050 }
 0x9c4   :  { %v1053_v19 = vmul.f32 %v1051_v20, %v1047_v18 }
 0x9c6   :  { %1055 = vrot.lane.b32.xlu1 %v1053_v19, %s2953_s26 }
 0xa30   :  { %v890_v26 = vpop.permute.xlu0 %889 }
 0xa31   :  { %v892_v27 = vadd.f32 %v890_v26, %v882_v25 }
 0xa33   :  { %2859 = vtanh.f32 %v892_v27 }
 0xa38   :  { %v1056_v30 = vpop.permute.xlu1 %1055 }
 0xa39   :  { %v1058_v32 = vadd.f32 %v1056_v30, %v1048_v28 }
 0xa3b   :  { %2861 = vtanh.f32 %v1058_v32 }
 0xa3d   :  { %v2860_v33 = vpop.eup %2859 }
 0xa3e   :  { %895 = vrot.lane.b32.xlu0 %v2860_v33, %s2953_s26 }
 0xa45   :  { %v2862_v34 = vpop.eup %2861 }
 0xa46   :  { %1061 = vrot.lane.b32.xlu1 %v2862_v34, %s2953_s26 }
 0xab0   :  { %v896_v35 = vpop.permute.xlu0 %895 }
 0xab1   :  { %v898_v37 = vmul.f32 %v896_v35, %v881_v14 }
 0xab3   :  { %900 = vrot.lane.b32.xlu0 %v898_v37, %s2954_s27 }
 0xab8   :  { %v1062_v38 = vpop.permute.xlu1 %1061 }
 0xab9   :  { %v1064_v39 = vmul.f32 %v1062_v38, %v1047_v18  ;;  %v170_v18 = vadd.f32 %v3091_v21, %v3008_v12 }
 0xabb   :  { %1066 = vrot.lane.b32.xlu1 %v1064_v39, %s2954_s27 }
 0xb25   :  { %v901_v40 = vpop.permute.xlu0 %900 }
 0xb26   :  { %2509 = vmatmul.mubr.msk.f32.vlgmr.msra.gmra.mrb[12].mxu0 %vm187_vm2, %v901_v40 }
 0xb27   :  { %2727 = vmatpush3.bf16.msra.mxu0 %v3013_v29  ;;  %2530 = vmatprep.mubr.msk.f32.mxu0 %vm2951_vm0, %v2952_v1 }
 0xb28   :  { %2728 = vmatprep.subr.bf16.mxu0 %v2950_v0 }
 0xb2b   :  { %2730 = vmatpush3.bf16.msra.mxu0 %v3016_v31 }
 0xb2c   :  { %2737 = vmatprep.subr.bf16.mxu0 %v2950_v0 }
 0xb2d   :  { %v1067_v41 = vpop.permute.xlu1 %1066 }
 0xb2e   :  { %2531 = vmatmul.mubr.msk.f32.vlgmr.msra.gmra.mrb[12].mxu0 %vm187_vm2, %v1067_v41 }
 0xb2f   :  { %2739 = vmatpush3.bf16.msra.mxu0 %v2988_v5  ;;  %2552 = vmatprep.mubr.msk.f32.mxu0 %vm2951_vm0, %v2952_v1 }
 0xb30   :  { %2740 = vmatprep.subr.bf16.mxu0 %v2950_v0 }
 0xb33   :  { %2742 = vmatpush3.bf16.msra.mxu0 %v2999_v10 }
 0xb34   :  { %2749 = vmatprep.subr.bf16.mxu0 %v2950_v0 }
 0xb36   :  { %2553 = vmatmul.mubr.msk.f32.vlgmr.msra.gmra.mrb[14].mxu0 %vm187_vm2, %v1067_v41 }
 0xb37   :  { %2751 = vmatpush3.bf16.msra.mxu0 %v3050_v63  ;;  %2574 = vmatprep.mubr.msk.f32.mxu0 %vm2951_vm0, %v2952_v1 }
 0xb38   :  { %2752 = vmatprep.subr.bf16.mxu0 %v2950_v0 }
 0xb3b   :  { %2754 = vmatpush3.bf16.msra.mxu0 %v3065_v9 }
 0xb3c   :  { %2761 = vmatprep.subr.bf16.mxu0 %v2950_v0 }
 0xc01   :  { %v1136_v42 = vpop.f32.mrb[12].mxu0 }
 0xc02   :  { %v2805_v43 = vadd.f32 %v3033_v36, %v1136_v42  ;;  %v2532_v44 = vpop.f32.mrb[13].mxu0 }
 0xc04   :  { %2863 = vtanh.f32 %v2805_v43 }
 0xc09   :  { %v1301_v46 = vpop.f32.mrb[14].mxu0 }
 0xc0a   :  { %v1305_v47 = vadd.f32 %v1301_v46, %v165_v45  ;;  %v2554_v48 = vpop.f32.mrb[15].mxu0 }
 0xc0c   :  { %2865 = vtanh.f32 %v1305_v47 }
 0xc0e   :  { %v2864_v49 = vpop.eup %2863 }
 0xc0f   :  { %1145 = vrot.lane.b32.xlu0 %v2864_v49, %s2953_s26  ;;  %v1141_v51 = vmul.f32 0.5, %v2864_v49 }
 0xc11   :  { %v1142_v52 = vadd.f32 0.5, %v1141_v51 }
 0xc13   :  { %v1143_v56 = vmul.f32 %v1142_v52, %v892_v27 }
 0xc16   :  { %v2866_v50 = vpop.eup %2865 }
 0xc17   :  { %1311 = vrot.lane.b32.xlu1 %v2866_v50, %s2953_s26  ;;  %v1307_v55 = vmul.f32 0.5, %v2866_v50 }
 0xc19   :  { %v1308_v57 = vadd.f32 0.5, %v1307_v55  ;;  %v175_v55 = vadd.f32 %v3008_v12, %v3097_v24 }
 0xc1b   :  { %v1309_v61 = vmul.f32 %v1308_v57, %v1058_v32 }
 0xc81   :  { %v1146_v53 = vpop.permute.xlu0 %1145 }
 0xc82   :  { %v1148_v54 = vmul.f32 %v1146_v53, %v1142_v52 }
 0xc84   :  { %1150 = vrot.lane.b32.xlu0 %v1148_v54, %s2953_s26 }
 0xc89   :  { %v1312_v58 = vpop.permute.xlu1 %1311 }
 0xc8a   :  { %v1314_v22 = vmul.f32 %v1312_v58, %v1308_v57 }
 0xc8c   :  { %1316 = vrot.lane.b32.xlu1 %v1314_v22, %s2953_s26 }
 0xcf6   :  { %v1151_v60 = vpop.permute.xlu0 %1150 }
 0xcf7   :  { %v1153_v59 = vadd.f32 %v1151_v60, %v1143_v56 }
 0xcf9   :  { %2867 = vtanh.f32 %v1153_v59 }
 0xcfe   :  { %v1317_v62 = vpop.permute.xlu1 %1316 }
 0xcff   :  { %v1319_v2 = vadd.f32 %v1317_v62, %v1309_v61 }
 0xd01   :  { %2869 = vtanh.f32 %v1319_v2 }
 0xd03   :  { %v2868_v3 = vpop.eup %2867 }
 0xd04   :  { %1156 = vrot.lane.b32.xlu0 %v2868_v3, %s2953_s26 }
 0xd0b   :  { %v2870_v4 = vpop.eup %2869 }
 0xd0c   :  { %1322 = vrot.lane.b32.xlu1 %v2870_v4, %s2953_s26 }
 0xd76   :  { %v1157_v6 = vpop.permute.xlu0 %1156 }
 0xd77   :  { %v1159_v7 = vmul.f32 %v1157_v6, %v1142_v52 }
 0xd79   :  { %1161 = vrot.lane.b32.xlu0 %v1159_v7, %s2954_s27 }
 0xd7e   :  { %v1323_v8 = vpop.permute.xlu1 %1322 }
 0xd7f   :  { %v1325_v11 = vmul.f32 %v1323_v8, %v1308_v57 }
 0xd81   :  { %1327 = vrot.lane.b32.xlu1 %v1325_v11, %s2954_s27 }
 0xdeb   :  { %v1162_v13 = vpop.permute.xlu0 %1161 }
 0xdec   :  { %2542 = vmatmul.mubr.msk.f32.vlgmr.msra.gmra.mrb[10].mxu1 %vm187_vm2, %v1162_v13 }
 0xded   :  { %2745 = vmatpush3.bf16.msra.mxu1 %v3013_v29  ;;  %2563 = vmatprep.mubr.msk.f32.mxu1 %vm2951_vm0, %v2952_v1 }
 0xdee   :  { %2746 = vmatprep.subr.bf16.mxu1 %v2950_v0 }
 0xdf1   :  { %2748 = vmatpush3.bf16.msra.mxu1 %v3016_v31 }
 0xdf2   :  { %2755 = vmatprep.subr.bf16.mxu1 %v2950_v0 }
 0xdf3   :  { %v1328_v14 = vpop.permute.xlu1 %1327 }
 0xdf4   :  { %2564 = vmatmul.mubr.msk.f32.vlgmr.msra.gmra.mrb[10].mxu1 %vm187_vm2, %v1328_v14 }
 0xdf5   :  { %2757 = vmatpush3.bf16.msra.mxu1 %v2988_v5  ;;  %2585 = vmatprep.mubr.msk.f32.mxu1 %vm2951_vm0, %v2952_v1 }
 0xdf6   :  { %2758 = vmatprep.subr.bf16.mxu1 %v2950_v0 }
 0xdf9   :  { %2760 = vmatpush3.bf16.msra.mxu1 %v2999_v10 }
 0xdfa   :  { %2767 = vmatprep.subr.bf16.mxu1 %v2950_v0 }
 0xdfc   :  { %2586 = vmatmul.mubr.msk.f32.vlgmr.msra.gmra.mrb[12].mxu1 %vm187_vm2, %v1328_v14 }
 0xdfd   :  { %2769 = vmatpush3.bf16.msra.mxu1 %v3050_v63  ;;  %2607 = vmatprep.mubr.msk.f32.mxu1 %vm2951_vm0, %v2952_v1 }
 0xdfe   :  { %2770 = vmatprep.subr.bf16.mxu1 %v2950_v0 }
 0xe01   :  { %2772 = vmatpush3.bf16.msra.mxu1 %v3065_v9 }
 0xe02   :  { %2779 = vmatprep.subr.bf16.mxu1 %v2950_v0 }
 0xec7   :  { %v1397_v15 = vpop.f32.mrb[10].mxu1 }
 0xec8   :  { %v2806_v16 = vadd.f32 %v3033_v36, %v1397_v15  ;;  %v2565_v17 = vpop.f32.mrb[11].mxu1 }
 0xeca   :  { %2871 = vtanh.f32 %v2806_v16 }
 0xecf   :  { %v1562_v20 = vpop.f32.mrb[12].mxu1 }
 0xed0   :  { %v1566_v19 = vadd.f32 %v1562_v20, %v170_v18  ;;  %v2587_v25 = vpop.f32.mrb[13].mxu1 }
 0xed2   :  { %2873 = vtanh.f32 %v1566_v19 }
 0xed4   :  { %v2872_v26 = vpop.eup %2871 }
 0xed5   :  { %1406 = vrot.lane.b32.xlu0 %v2872_v26, %s2953_s26  ;;  %v1402_v28 = vmul.f32 0.5, %v2872_v26 }
 0xed7   :  { %v1403_v30 = vadd.f32 0.5, %v1402_v28 }
 0xed9   :  { %v1404_v38 = vmul.f32 %v1403_v30, %v1153_v59 }
 0xedc   :  { %v2874_v27 = vpop.eup %2873 }
 0xedd   :  { %1572 = vrot.lane.b32.xlu1 %v2874_v27, %s2953_s26  ;;  %v1568_v34 = vmul.f32 0.5, %v2874_v27 }
 0xedf   :  { %v1569_v35 = vadd.f32 0.5, %v1568_v34 }
 0xee1   :  { %v1570_v41 = vmul.f32 %v1569_v35, %v1319_v2 }
 0xf47   :  { %v1407_v32 = vpop.permute.xlu0 %1406 }
 0xf48   :  { %v1409_v33 = vmul.f32 %v1407_v32, %v1403_v30 }
 0xf4a   :  { %1411 = vrot.lane.b32.xlu0 %v1409_v33, %s2953_s26 }
 0xf4f   :  { %v1573_v37 = vpop.permute.xlu1 %1572 }
 0xf50   :  { %v1575_v21 = vmul.f32 %v1573_v37, %v1569_v35 }
 0xf52   :  { %1577 = vrot.lane.b32.xlu1 %v1575_v21, %s2953_s26 }
 0xfbc   :  { %v1412_v39 = vpop.permute.xlu0 %1411 }
 0xfbd   :  { %v1414_v40 = vadd.f32 %v1412_v39, %v1404_v38 }
 0xfbf   :  { %2875 = vtanh.f32 %v1414_v40 }
 0xfc4   :  { %v1578_v42 = vpop.permute.xlu1 %1577 }
 0xfc5   :  { %v1580_v43 = vadd.f32 %v1578_v42, %v1570_v41 }
 0xfc7   :  { %2877 = vtanh.f32 %v1580_v43 }
 0xfc9   :  { %v2876_v44 = vpop.eup %2875 }
 0xfca   :  { %1417 = vrot.lane.b32.xlu0 %v2876_v44, %s2953_s26 }
 0xfd1   :  { %v2878_v45 = vpop.eup %2877 }
 0xfd2   :  { %1583 = vrot.lane.b32.xlu1 %v2878_v45, %s2953_s26 }
0x103c   :  { %v1418_v46 = vpop.permute.xlu0 %1417 }
0x103d   :  { %v1420_v47 = vmul.f32 %v1418_v46, %v1403_v30  ;;  %v180_v30 = vadd.f32 %v3095_v23, %v3008_v12 }
0x103f   :  { %1422 = vrot.lane.b32.xlu0 %v1420_v47, %s2954_s27 }
0x1044   :  { %v1584_v48 = vpop.permute.xlu1 %1583 }
0x1045   :  { %v1586_v49 = vmul.f32 %v1584_v48, %v1569_v35 }
0x1047   :  { %1588 = vrot.lane.b32.xlu1 %v1586_v49, %s2954_s27 }
0x10b1   :  { %v1423_v50 = vpop.permute.xlu0 %1422 }
0x10b2   :  { %2575 = vmatmul.mubr.msk.f32.vlgmr.msra.gmra.mrb[16].mxu0 %vm187_vm2, %v1423_v50 }
0x10b3   :  { %2763 = vmatpush3.bf16.msra.mxu0 %v3013_v29  ;;  %2596 = vmatprep.mubr.msk.f32.mxu0 %vm2951_vm0, %v2952_v1 }
0x10b4   :  { %2764 = vmatprep.subr.bf16.mxu0 %v2950_v0 }
0x10b7   :  { %2766 = vmatpush3.bf16.msra.mxu0 %v3016_v31 }
0x10b8   :  { %2773 = vmatprep.subr.bf16.mxu0 %v2950_v0 }
0x10b9   :  { %v1589_v51 = vpop.permute.xlu1 %1588 }
0x10ba   :  { %2597 = vmatmul.mubr.msk.f32.vlgmr.msra.gmra.mrb[16].mxu0 %vm187_vm2, %v1589_v51 }
0x10bb   :  { %2775 = vmatpush3.bf16.msra.mxu0 %v2988_v5  ;;  %2618 = vmatprep.mubr.msk.f32.mxu0 %vm2951_vm0, %v2952_v1 }
0x10bc   :  { %2776 = vmatprep.subr.bf16.mxu0 %v2950_v0 }
0x10bf   :  { %2778 = vmatpush3.bf16.msra.mxu0 %v2999_v10 }
0x10c0   :  { %2785 = vmatprep.subr.bf16.mxu0 %v2950_v0 }
0x10c2   :  { %2619 = vmatmul.mubr.msk.f32.vlgmr.msra.gmra.mrb[18].mxu0 %vm187_vm2, %v1589_v51 }
0x10c3   :  { %2787 = vmatpush3.bf16.msra.mxu0 %v3050_v63  ;;  %2640 = vmatprep.mubr.msk.f32.mxu0 %vm2951_vm0, %v2952_v1 }
0x10c4   :  { %2788 = vmatprep.subr.bf16.mxu0 %v2950_v0 }
0x10c7   :  { %2790 = vmatpush3.bf16.msra.mxu0 %v3065_v9 }
0x10c8   :  { %2797 = vmatprep.subr.bf16.mxu0 %v2950_v0 }
0x118d   :  { %v1658_v52 = vpop.f32.mrb[16].mxu0 }
0x118e   :  { %v2807_v53 = vadd.f32 %v3033_v36, %v1658_v52  ;;  %v2598_v54 = vpop.f32.mrb[17].mxu0 }
0x1190   :  { %2879 = vtanh.f32 %v2807_v53 }
0x1195   :  { %v1823_v57 = vpop.f32.mrb[18].mxu0 }
0x1196   :  { %v1827_v58 = vadd.f32 %v1823_v57, %v175_v55  ;;  %v2620_v63 = vpop.f32.mrb[19].mxu0 }
0x1198   :  { %2881 = vtanh.f32 %v1827_v58 }
0x119a   :  { %v2880_v22 = vpop.eup %2879 }
0x119b   :  { %1667 = vrot.lane.b32.xlu0 %v2880_v22, %s2953_s26  ;;  %v1663_v9 = vmul.f32 0.5, %v2880_v22 }
0x119d   :  { %v1664_v60 = vadd.f32 0.5, %v1663_v9 }
0x119f   :  { %v1665_v4 = vmul.f32 %v1664_v60, %v1414_v40 }
0x11a2   :  { %v2882_v56 = vpop.eup %2881 }
0x11a3   :  { %1833 = vrot.lane.b32.xlu1 %v2882_v56, %s2953_s26  ;;  %v1829_v62 = vmul.f32 0.5, %v2882_v56 }
0x11a5   :  { %v1830_v2 = vadd.f32 0.5, %v1829_v62 }
0x11a7   :  { %v1831_v8 = vmul.f32 %v1830_v2, %v1580_v43 }
0x120d   :  { %v1668_v59 = vpop.permute.xlu0 %1667 }
0x120e   :  { %v1670_v61 = vmul.f32 %v1668_v59, %v1664_v60 }
0x1210   :  { %1672 = vrot.lane.b32.xlu0 %v1670_v61, %s2953_s26 }
0x1215   :  { %v1834_v3 = vpop.permute.xlu1 %1833 }
0x1216   :  { %v1836_v24 = vmul.f32 %v1834_v3, %v1830_v2 }
0x1218   :  { %1838 = vrot.lane.b32.xlu1 %v1836_v24, %s2953_s26 }
0x1282   :  { %v1673_v6 = vpop.permute.xlu0 %1672 }
0x1283   :  { %v1675_v7 = vadd.f32 %v1673_v6, %v1665_v4 }
0x1285   :  { %2883 = vtanh.f32 %v1675_v7 }
0x128a   :  { %v1839_v11 = vpop.permute.xlu1 %1838 }
0x128b   :  { %v1841_v13 = vadd.f32 %v1839_v11, %v1831_v8 }
0x128d   :  { %2885 = vtanh.f32 %v1841_v13 }
0x128f   :  { %v2884_v14 = vpop.eup %2883 }
0x1290   :  { %1678 = vrot.lane.b32.xlu0 %v2884_v14, %s2953_s26 }
0x1297   :  { %v2886_v15 = vpop.eup %2885 }
0x1298   :  { %1844 = vrot.lane.b32.xlu1 %v2886_v15, %s2953_s26 }
0x1302   :  { %v1679_v16 = vpop.permute.xlu0 %1678 }
0x1303   :  { %v1681_v17 = vmul.f32 %v1679_v16, %v1664_v60 }
0x1305   :  { %1683 = vrot.lane.b32.xlu0 %v1681_v17, %s2954_s27 }
0x130a   :  { %v1845_v18 = vpop.permute.xlu1 %1844 }
0x130b   :  { %v1847_v20 = vmul.f32 %v1845_v18, %v1830_v2 }
0x130d   :  { %1849 = vrot.lane.b32.xlu1 %v1847_v20, %s2954_s27 }
0x1377   :  { %v1684_v19 = vpop.permute.xlu0 %1683 }
0x1378   :  { %2608 = vmatmul.mubr.msk.f32.vlgmr.msra.gmra.mrb[14].mxu1 %vm187_vm2, %v1684_v19 }
0x1379   :  { %2781 = vmatpush3.bf16.msra.mxu1 %v3013_v29  ;;  %2629 = vmatprep.mubr.msk.f32.mxu1 %vm2951_vm0, %v2952_v1 }
0x137a   :  { %2782 = vmatprep.subr.bf16.mxu1 %v2950_v0 }
0x137d   :  { %2784 = vmatpush3.bf16.msra.mxu1 %v3016_v31 }
0x137e   :  { %2791 = vmatprep.subr.bf16.mxu1 %v2950_v0 }
0x137f   :  { %v1850_v25 = vpop.permute.xlu1 %1849 }
0x1380   :  { %2630 = vmatmul.mubr.msk.f32.vlgmr.msra.gmra.mrb[14].mxu1 %vm187_vm2, %v1850_v25 }
0x1381   :  { %2793 = vmatpush3.bf16.msra.mxu1 %v2988_v5  ;;  %2651 = vmatprep.mubr.msk.f32.mxu1 %vm2951_vm0, %v2952_v1 }
0x1382   :  { %2794 = vmatprep.subr.bf16.mxu1 %v2950_v0 }
0x1385   :  { %2796 = vmatpush3.bf16.msra.mxu1 %v2999_v10 }
0x1388   :  { %2652 = vmatmul.mubr.msk.f32.vlgmr.msra.gmra.mrb[16].mxu1 %vm187_vm2, %v1850_v25 }
0x1453   :  { %v1919_v26 = vpop.f32.mrb[14].mxu1 }
0x1454   :  { %v2808_v27 = vadd.f32 %v3033_v36, %v1919_v26  ;;  %v2631_v28 = vpop.f32.mrb[15].mxu1 }
0x1456   :  { %2887 = vtanh.f32 %v2808_v27 }
0x145b   :  { %v2084_v32 = vpop.f32.mrb[16].mxu1 }
0x145c   :  { %v2088_v33 = vadd.f32 %v2084_v32, %v180_v30  ;;  %v2653_v5 = vpop.f32.mrb[17].mxu1 }
0x145e   :  { %2889 = vtanh.f32 %v2088_v33 }
0x1460   :  { %v2888_v34 = vpop.eup %2887 }
0x1461   :  { %1928 = vrot.lane.b32.xlu0 %v2888_v34, %s2953_s26  ;;  %v1924_v10 = vmul.f32 0.5, %v2888_v34 }
0x1463   :  { %v1925_v37 = vadd.f32 0.5, %v1924_v10 }
0x1465   :  { %v1926_v23 = vmul.f32 %v1925_v37, %v1675_v7 }
0x1468   :  { %v2890_v35 = vpop.eup %2889 }
0x1469   :  { %2094 = vrot.lane.b32.xlu1 %v2890_v35, %s2953_s26  ;;  %v2090_v39 = vmul.f32 0.5, %v2890_v35 }
0x146b   :  { %v2091_v40 = vadd.f32 0.5, %v2090_v39 }
0x146d   :  { %v2092_v44 = vmul.f32 %v2091_v40, %v1841_v13 }
0x14d3   :  { %v1929_v21 = vpop.permute.xlu0 %1928 }
0x14d4   :  { %v1931_v38 = vmul.f32 %v1929_v21, %v1925_v37 }
0x14d6   :  { %1933 = vrot.lane.b32.xlu0 %v1931_v38, %s2953_s26 }
0x14db   :  { %v2095_v41 = vpop.permute.xlu1 %2094 }
0x14dc   :  { %v2097_v12 = vmul.f32 %v2095_v41, %v2091_v40 }
0x14de   :  { %2099 = vrot.lane.b32.xlu1 %v2097_v12, %s2953_s26 }
0x1548   :  { %v1934_v42 = vpop.permute.xlu0 %1933 }
0x1549   :  { %v1936_v43 = vadd.f32 %v1934_v42, %v1926_v23 }
0x154b   :  { %2891 = vtanh.f32 %v1936_v43 }
0x1550   :  { %v2100_v45 = vpop.permute.xlu1 %2099 }
0x1551   :  { %v2102_v46 = vadd.f32 %v2100_v45, %v2092_v44 }
0x1553   :  { %2893 = vtanh.f32 %v2102_v46 }
0x1555   :  { %v2892_v47 = vpop.eup %2891 }
0x1556   :  { %1939 = vrot.lane.b32.xlu0 %v2892_v47, %s2953_s26 }
0x155d   :  { %v2894_v48 = vpop.eup %2893 }
0x155e   :  { %2105 = vrot.lane.b32.xlu1 %v2894_v48, %s2953_s26 }
0x15c8   :  { %v1940_v49 = vpop.permute.xlu0 %1939 }
0x15c9   :  { %v1942_v50 = vmul.f32 %v1940_v49, %v1925_v37 }
0x15cb   :  { %1944 = vrot.lane.b32.xlu0 %v1942_v50, %s2954_s27 }
0x15d0   :  { %v2106_v51 = vpop.permute.xlu1 %2105 }
0x15d1   :  { %v2108_v52 = vmul.f32 %v2106_v51, %v2091_v40 }
0x15d3   :  { %2110 = vrot.lane.b32.xlu1 %v2108_v52, %s2954_s27 }
0x163d   :  { %v1945_v53 = vpop.permute.xlu0 %1944 }
0x163e   :  { %2641 = vmatmul.mubr.msk.f32.vlgmr.msra.gmra.mrb[20].mxu0 %vm187_vm2, %v1945_v53 }
0x163f   :  { %2799 = vmatpush3.bf16.msra.mxu0 %v3013_v29  ;;  %2662 = vmatprep.mubr.msk.f32.mxu0 %vm2951_vm0, %v2952_v1 }
0x1640   :  { %2800 = vmatprep.subr.bf16.mxu0 %v2950_v0 }
0x1643   :  { %2802 = vmatpush3.bf16.msra.mxu0 %v3016_v31 }
0x1645   :  { %v2111_v54 = vpop.permute.xlu1 %2110 }
0x1646   :  { %2206 = vst.msk [vmem:[#allocation5] sm:$0x3] %vm2205_vm3, %v2111_v54  ;;  %2663 = vmatmul.mubr.msk.f32.vlgmr.msra.gmra.mrb[20].mxu0 %vm187_vm2, %v2111_v54 }
0x1719   :  { %v2180_v55 = vpop.f32.mrb[20].mxu0 }
0x171a   :  { %v2809_v57 = vadd.f32 %v3033_v36, %v2180_v55  ;;  %v2664_v58 = vpop.f32.mrb[21].mxu0 }
0x171c   :  { %2895 = vtanh.f32 %v2809_v57 }
0x1726   :  { %v2896_v63 = vpop.eup %2895 }
0x1727   :  { %2189 = vrot.lane.b32.xlu0 %v2896_v63, %s2953_s26  ;;  %v2185_v29 = vmul.f32 0.5, %v2896_v63 }
0x1729   :  { %v2186_v1 = vadd.f32 0.5, %v2185_v29 }
0x172b   :  { %v2187_v31 = vmul.f32 %v2186_v1, %v1936_v43 }
0x1799   :  { %v2190_v22 = vpop.permute.xlu0 %2189 }
0x179a   :  { %v2192_v0 = vmul.f32 %v2190_v22, %v2186_v1 }
0x179c   :  { %2194 = vrot.lane.b32.xlu1 %v2192_v0, %s2953_s26 }
0x180e   :  { %v2195_v56 = vpop.permute.xlu1 %2194 }
0x180f   :  { %v2197_v9 = vadd.f32 %v2195_v56, %v2187_v31 }
0x1811   :  { %2897 = vtanh.f32 %v2197_v9 }
0x181b   :  { %v2898_v60 = vpop.eup %2897 }
0x181c   :  { %2200 = vrot.lane.b32.xlu0 %v2898_v60, %s2953_s26 }
0x1820   :  { %2214 = vrot.lane.b32.xlu0 %v2102_v46, %s2955_s0 }
0x188e   :  { %v2201_v36 = vpop.permute.xlu0 %2200 }
0x188f   :  { %v2203_v59 = vmul.f32 %v2201_v36, %v2186_v1 }
0x1891   :  { %2208 = vrot.lane.b32.xlu1 %v2203_v59, %s2954_s27 }
0x1892   :  { %v2215_v61 = vpop.permute.xlu0 %2214 }
0x1893   :  { %2218 = vst.msk [vmem:[#allocation5 + $0x4] sm:$0x3] %vm2205_vm3, %v2215_v61 }
0x1895   :  { %2220 = vrot.lane.b32.xlu1 %v2197_v9, %s2955_s0 }
0x1903   :  { %v2209_v62 = vpop.permute.xlu1 %2208 }
0x1904   :  { %2212 = vst.msk [vmem:[#allocation5 + $0x2] sm:$0x3] %vm2205_vm3, %v2209_v62 }
0x1907   :  { %v2221_v2 = vpop.permute.xlu1 %2220 }
0x1908   :  { %2224 = vst.msk [vmem:[#allocation5 + $0x6] sm:$0x3] %vm2205_vm3, %v2221_v2 }
0x1909   :  { %2932 = shalt.err (!%p2929_p12)
}
0x190a   :  { %s2933_s17 = scalar_lea.hbm %s3317_s2, 128 }
0x190b   :  { %p2934_p13 = scmp.ne.s32.totalorder %s3317_s2, %s2933_s17  ;;  %p2937_p0 = scmp.lt.u32.totalorder %s2933_s17, %s3317_s2 }
0x190d   :  { %p2939_p1 = pnand %p2937_p0, %p2934_p13 }
0x190f   :  { %2942 = shalt.err (!%p2939_p1)
}
0x1910   :  { %s2957_s22 = smov 2  }
0x1911   :  { %2236 = dma.vmem_to_hbm [thread:$0]  %s2231_s13, 128, %s3317_s2, [#allocation4], %s2953_s26, %s2953_s26, %s2957_s22  }
0x1912   :  { %2945 = dma.done.wait [#allocation4], 128  }
0x1913   :  { %2946 = vsyncadd [#allocation4], 4294967168 }
0x1914   :  { %2240 = vsyncpa [#allocation3], 1 }
0x1915   :  { %2241 = vsyncpa [#allocation4], 1 }

</bundles_post_ra>
